<compile_context>
chip_gen: v5e
topology: v5e:2x2
jax: 0.10.0
libtpu: 0.0.40
codegen_flags: <defaults>
</compile_context>

<pallas_src>
import jax
import jax.numpy as jnp
import numpy as np
from jax.experimental import pallas as pl
from jax.experimental.pallas import tpu as pltpu


def _make_kernel(num_layers, hidden_dim, history_len, eps=1e-5):
    L, H, T = num_layers, hidden_dim, history_len
    assert L == 2, "fused wavefront kernel is specialized to num_layers == 2"
    # TODO(synk): generalize the wavefront recurrence to arbitrary num_layers.

    def kernel(x_ref, gamma_ref, beta_ref, w_init_ref, b_init_ref,
               w_ih0w_ref, b_fused_ref, rhs_ref, w_bd_ref, b_out_ref, out_ref):
        x = x_ref[...]                                     # (B, D) f32
        B = x.shape[0]

        # ---- LayerNorm (biased variance, eps=1e-5, torch semantics) ----
        mean = jnp.mean(x, axis=-1, keepdims=True)
        var = jnp.mean((x - mean) ** 2, axis=-1, keepdims=True)
        xn = (x - mean) * jax.lax.rsqrt(var + eps) * gamma_ref[...] + beta_ref[...]

        # ---- fc_init: (B, 2*L*H) ----
        hc = jnp.dot(xn, w_init_ref[...],
                     preferred_element_type=jnp.float32) + b_init_ref[...]

        # ---- torch-style entangled (B, L*H) -> (L, B, H) de-entanglement ----
        # Packed state layout: lanes [0,H) = layer 0, [H,2H) = layer 1.
        # Built from static lane slices (values) + sublane one-hot selects;
        # no scratch, no masked stores, no VMEM round trip.
        h_rows, c_rows = [], []
        for b in range(B):
            hp, cp = [], []
            for l in range(L):
                i = l * B + b
                r, cb = i // L, (i % L) * H
                hp.append(hc[r:r + 1, cb:cb + H])
                cp.append(hc[r:r + 1, L * H + cb:L * H + cb + H])
            h_rows.append(jnp.concatenate(hp, axis=-1))    # (1, L*H)
            c_rows.append(jnp.concatenate(cp, axis=-1))
        ridx = jax.lax.broadcasted_iota(jnp.int32, (B, L * H), 0)
        h_pk, c_pk = h_rows[0], c_rows[0]
        for b in range(1, B):
            h_pk = jnp.where(ridx == b, h_rows[b], h_pk)   # (B, 2H) [h0 | h1]
            c_pk = jnp.where(ridx == b, c_rows[b], c_pk)   # (B, 2H) [c0 | c1]

        # ---- per-step-invariant fused bias (layer-0 input proj hoisted) ----
        # Fused gate lanes: [i0 i1 | f0 f1 | o0 o1 | g0 g1], each slab H wide.
        bias_f = jnp.dot(xn, w_ih0w_ref[...],
                         preferred_element_type=jnp.float32) + b_fused_ref[...]
        rhs = rhs_ref[...]                                 # (2H, 8H)

        # ---- prologue: layer-0 cell at t=0 (cell1 lanes discarded) ----
        gall = jnp.dot(h_pk, rhs, preferred_element_type=jnp.float32) + bias_f
        i0 = jax.nn.sigmoid(gall[:, 0:H])
        f0 = jax.nn.sigmoid(gall[:, 2 * H:3 * H])
        o0 = jax.nn.sigmoid(gall[:, 4 * H:5 * H])
        g0 = jnp.tanh(gall[:, 6 * H:7 * H])
        c0 = f0 * c_pk[:, :H] + i0 * g0
        h0 = o0 * jnp.tanh(c0)
        h_pk = jnp.concatenate([h0, h_pk[:, H:]], axis=-1)  # [h0(0) | h1_init]
        c_pk = jnp.concatenate([c0, c_pk[:, H:]], axis=-1)  # [c0(0) | c1_init]

        # ---- wavefront recurrence: ONE fused matmul per step ----
        hs = []
        for _ in range(T):
            gall = jnp.dot(h_pk, rhs, preferred_element_type=jnp.float32) + bias_f
            sig = jax.nn.sigmoid(gall[:, :6 * H])          # i/f/o, both cells
            g = jnp.tanh(gall[:, 6 * H:])                  # g, both cells
            c_pk = sig[:, 2 * H:4 * H] * c_pk + sig[:, 0:2 * H] * g
            h_pk = sig[:, 4 * H:6 * H] * jnp.tanh(c_pk)    # [h0(t+1) | h1(t)]
            hs.append(h_pk)
        # (at t=T-1 the cell0 half is computed but unused — free under the MXU)

        # ---- fc_out: register-resident accumulation, one matmul, one store --
        h_all = jnp.concatenate(hs, axis=-1)               # (B, T*2H)
        y = jnp.dot(h_all, w_bd_ref[...],
                    preferred_element_type=jnp.float32) + b_out_ref[...]
        out_ref[...] = y.astype(out_ref.dtype)             # (B, 128) lane-dense

    return kernel


def lstm_aug_generator(x, params, *, num_layers, hidden_dim, history_len, output_dim):
    B, D = x.shape
    L, H, T, O = num_layers, hidden_dim, history_len, output_dim
    assert L == 2, "fused wavefront kernel is specialized to num_layers == 2"
    out_w = max(128, ((T * O + 127) // 128) * 128)         # lane-dense width

    # ---- wrapper-side layout plumbing: gate reorder + wavefront fusion ----
    # Params store LSTM weights pre-transposed (in_dim, 4H) in torch gate order
    # (i, f, g, o).  Fused layout groups sigmoid gates first (i, f, o, g), each
    # gate slab interleaved (cell0 | cell1).
    gate_ids = (0, 1, 3, 2)                                # i, f, o, g
    slab = lambda w, g: w[:, g * H:(g + 1) * H]
    w_ih0, w_hh0 = params['w_ih_0'], params['w_hh_0']
    w_ih1, w_hh1 = params['w_ih_1'], params['w_hh_1']
    b0 = params['b_ih_0'] + params['b_hh_0']
    b1 = params['b_ih_1'] + params['b_hh_1']
    zH = jnp.zeros((H, H), jnp.float32)
    zD = jnp.zeros((D, H), jnp.float32)

    rhs_cols, wih0_cols, b_cols = [], [], []
    for g in gate_ids:
        # cell0 columns: gates0(t+1) = h0(t) @ W_hh0  (+ hoisted xn-proj bias)
        rhs_cols.append(jnp.concatenate([slab(w_hh0, g), zH], axis=0))
        wih0_cols.append(slab(w_ih0, g))
        b_cols.append(slab(b0, g))
        # cell1 columns: gates1(t) = h0(t) @ W_ih1 + h1(t-1) @ W_hh1 + b1
        rhs_cols.append(jnp.concatenate([slab(w_ih1, g), slab(w_hh1, g)], axis=0))
        wih0_cols.append(zD)
        b_cols.append(slab(b1, g))
    rhs_fused = jnp.concatenate(rhs_cols, axis=1)          # (2H, 8H)
    w_ih0_wide = jnp.concatenate(wih0_cols, axis=1)        # (D, 8H)
    b_fused = jnp.concatenate(b_cols, axis=1)              # (1, 8H)

    # Block-diagonal fc_out weight: rows index the lane-concatenated packed
    # states [h0(t+1)|h1(t)]; only the h1 halves feed the output columns.
    w_bd = jnp.zeros((T * 2 * H, out_w), jnp.float32)
    b_out_t = jnp.zeros((1, out_w), jnp.float32)
    for t in range(T):
        w_bd = w_bd.at[t * 2 * H + H:(t + 1) * 2 * H, t * O:(t + 1) * O].set(params['w_out'])
        b_out_t = b_out_t.at[:, t * O:(t + 1) * O].set(params['b_out'])

    kernel = _make_kernel(L, H, T)
    vmem = pl.BlockSpec(memory_space=pltpu.MemorySpace.VMEM)
    inputs = [x, params['ln_gamma'], params['ln_beta'],
              params['w_init'], params['b_init'],
              w_ih0_wide, b_fused, rhs_fused, w_bd, b_out_t]
    y_wide = pl.pallas_call(
        kernel,
        out_shape=jax.ShapeDtypeStruct((B, out_w), jnp.float32),
        in_specs=[vmem] * len(inputs),
        out_specs=vmem,
    )(*inputs)
    # lanes [t*O:(t+1)*O] hold y(t); slice + reshape is wrapper layout plumbing
    return y_wide[:, :T * O].reshape(B, T, O)


def init_params(key, noise_input_dim, output_dim, hidden_dim, num_layers):
    D, H, L, O = noise_input_dim, hidden_dim, num_layers, output_dim
    keys = jax.random.split(key, 8 + 4 * L)
    p = {}
    p['ln_gamma'] = 1.0 + 0.1 * jax.random.normal(keys[0], (1, D), jnp.float32)
    p['ln_beta'] = 0.1 * jax.random.normal(keys[1], (1, D), jnp.float32)
    # fc_init weight stored pre-transposed: (D, 2*L*H)
    p['w_init'] = 0.1 * jax.random.normal(keys[2], (D, 2 * L * H), jnp.float32)
    p['b_init'] = 0.1 * jax.random.normal(keys[3], (1, 2 * L * H), jnp.float32)
    ki = 4
    for l in range(L):
        in_dim = D if l == 0 else H
        # LSTM weights pre-transposed: (in_dim, 4H) / (H, 4H), gate order i,f,g,o
        p[f'w_ih_{l}'] = 0.1 * jax.random.normal(keys[ki], (in_dim, 4 * H), jnp.float32); ki += 1
        p[f'w_hh_{l}'] = 0.1 * jax.random.normal(keys[ki], (H, 4 * H), jnp.float32); ki += 1
        p[f'b_ih_{l}'] = 0.1 * jax.random.normal(keys[ki], (1, 4 * H), jnp.float32); ki += 1
        p[f'b_hh_{l}'] = 0.1 * jax.random.normal(keys[ki], (1, 4 * H), jnp.float32); ki += 1
    p['w_out'] = 0.1 * jax.random.normal(keys[ki], (H, O), jnp.float32); ki += 1
    p['b_out'] = 0.1 * jax.random.normal(keys[ki], (1, O), jnp.float32)
    return p


def reference(x, params, *, num_layers, hidden_dim, history_len, output_dim):
    """Pure-JAX reference mirroring the PyTorch forward semantics."""
    L, H, T = num_layers, hidden_dim, history_len
    B, _ = x.shape
    mean = jnp.mean(x, -1, keepdims=True)
    var = jnp.mean((x - mean) ** 2, -1, keepdims=True)
    xn = (x - mean) / jnp.sqrt(var + 1e-5) * params['ln_gamma'] + params['ln_beta']
    hc = xn @ params['w_init'] + params['b_init']
    h_part, c_part = hc[:, :L * H], hc[:, L * H:]
    h = list(h_part.reshape(L, B, H))   # same row-major reshape as torch .reshape
    c = list(c_part.reshape(L, B, H))
    ys = []
    for _ in range(T):
        inp = xn
        for l in range(L):
            gates = (inp @ params[f'w_ih_{l}'] + h[l] @ params[f'w_hh_{l}']
                     + params[f'b_ih_{l}'] + params[f'b_hh_{l}'])
            i_g = jax.nn.sigmoid(gates[:, :H])
            f_g = jax.nn.sigmoid(gates[:, H:2 * H])
            g_g = jnp.tanh(gates[:, 2 * H:3 * H])
            o_g = jax.nn.sigmoid(gates[:, 3 * H:])
            c[l] = f_g * c[l] + i_g * g_g
            h[l] = o_g * jnp.tanh(c[l])
            inp = h[l]
        ys.append(h[-1] @ params['w_out'] + params['b_out'])
    return jnp.stack(ys, axis=1)


if __name__ == "__main__":
    # Small shapes consistent with the module's forward.
    noise_input_dim, output_dim, hidden_dim, history_len, num_layers = 8, 4, 32, 8, 2
    batch = 2

    key = jax.random.PRNGKey(0)
    kx, kp = jax.random.split(key)
    x = jax.random.normal(kx, (batch, noise_input_dim), jnp.float32)
    params = init_params(kp, noise_input_dim, output_dim, hidden_dim, num_layers)

    y = lstm_aug_generator(x, params, num_layers=num_layers, hidden_dim=hidden_dim,
                           history_len=history_len, output_dim=output_dim)
    y = jax.block_until_ready(y)

    y_ref = reference(x, params, num_layers=num_layers, hidden_dim=hidden_dim,
                      history_len=history_len, output_dim=output_dim)

    assert y.shape == (batch, history_len, output_dim)
    np.testing.assert_allclose(np.asarray(y), np.asarray(y_ref), rtol=1e-4, atol=1e-4)
    print("KERNEL_OK")
</pallas_src>

<mosaic_0001>
module attributes {stable_mosaic.version = 11 : i64} {
  func.func @kernel(%arg0: memref<2x8xf32, #tpu.memory_space<vmem>>, %arg1: memref<1x8xf32, #tpu.memory_space<vmem>>, %arg2: memref<1x8xf32, #tpu.memory_space<vmem>>, %arg3: memref<8x128xf32, #tpu.memory_space<vmem>>, %arg4: memref<1x128xf32, #tpu.memory_space<vmem>>, %arg5: memref<8x256xf32, #tpu.memory_space<vmem>>, %arg6: memref<1x256xf32, #tpu.memory_space<vmem>>, %arg7: memref<64x256xf32, #tpu.memory_space<vmem>>, %arg8: memref<512x128xf32, #tpu.memory_space<vmem>>, %arg9: memref<1x128xf32, #tpu.memory_space<vmem>>, %arg10: memref<2x128xf32, #tpu.memory_space<vmem>>) attributes {dimension_semantics = [], scalar_prefetch = 0 : i64, scratch_operands = 0 : i64, tpu.core_type = #tpu.core_type<tc>} {
    %c0 = arith.constant 0 : index
    %c0_0 = arith.constant 0 : index
    %0 = vector.load %arg0[%c0, %c0_0] : memref<2x8xf32, #tpu.memory_space<vmem>>, vector<2x8xf32>
    %cst = arith.constant dense<0.000000e+00> : vector<2xf32>
    %1 = vector.multi_reduction <add>, %0, %cst [1] : vector<2x8xf32> to vector<2xf32>
    %2 = vector.shape_cast %1 : vector<2xf32> to vector<2x1xf32>
    %cst_1 = arith.constant 8.000000e+00 : f32
    %3 = vector.broadcast %cst_1 : f32 to vector<2x1xf32>
    %4 = arith.divf %2, %3 : vector<2x1xf32>
    %5 = vector.broadcast %4 : vector<2x1xf32> to vector<2x8xf32>
    %6 = arith.subf %0, %5 : vector<2x8xf32>
    %7 = arith.mulf %6, %6 : vector<2x8xf32>
    %cst_2 = arith.constant dense<0.000000e+00> : vector<2xf32>
    %8 = vector.multi_reduction <add>, %7, %cst_2 [1] : vector<2x8xf32> to vector<2xf32>
    %9 = vector.shape_cast %8 : vector<2xf32> to vector<2x1xf32>
    %cst_3 = arith.constant 8.000000e+00 : f32
    %10 = vector.broadcast %cst_3 : f32 to vector<2x1xf32>
    %11 = arith.divf %9, %10 : vector<2x1xf32>
    %12 = vector.broadcast %4 : vector<2x1xf32> to vector<2x8xf32>
    %13 = arith.subf %0, %12 : vector<2x8xf32>
    %cst_4 = arith.constant 9.99999974E-6 : f32
    %14 = vector.broadcast %cst_4 : f32 to vector<2x1xf32>
    %15 = arith.addf %11, %14 : vector<2x1xf32>
    %16 = math.rsqrt %15 : vector<2x1xf32>
    %17 = vector.broadcast %16 : vector<2x1xf32> to vector<2x8xf32>
    %18 = arith.mulf %13, %17 : vector<2x8xf32>
    %c0_5 = arith.constant 0 : index
    %c0_6 = arith.constant 0 : index
    %19 = vector.load %arg1[%c0_5, %c0_6] : memref<1x8xf32, #tpu.memory_space<vmem>>, vector<1x8xf32>
    %20 = vector.broadcast %19 : vector<1x8xf32> to vector<2x8xf32>
    %21 = arith.mulf %18, %20 : vector<2x8xf32>
    %c0_7 = arith.constant 0 : index
    %c0_8 = arith.constant 0 : index
    %22 = vector.load %arg2[%c0_7, %c0_8] : memref<1x8xf32, #tpu.memory_space<vmem>>, vector<1x8xf32>
    %23 = vector.broadcast %22 : vector<1x8xf32> to vector<2x8xf32>
    %24 = arith.addf %21, %23 : vector<2x8xf32>
    %c0_9 = arith.constant 0 : index
    %c0_10 = arith.constant 0 : index
    %25 = vector.load %arg3[%c0_9, %c0_10] : memref<8x128xf32, #tpu.memory_space<vmem>>, vector<8x128xf32>
    %cst_11 = arith.constant dense<0.000000e+00> : vector<2x128xf32>
    %26 = tpu.matmul %24, %25, %cst_11 {dimension_numbers = #tpu.dot_dimension_numbers<[1], [0], [0], [1], [0, 0, 1, 1], [], []>} : vector<2x8xf32>, vector<8x128xf32>, vector<2x128xf32> -> vector<2x128xf32>
    %c0_12 = arith.constant 0 : index
    %c0_13 = arith.constant 0 : index
    %27 = vector.load %arg4[%c0_12, %c0_13] : memref<1x128xf32, #tpu.memory_space<vmem>>, vector<1x128xf32>
    %28 = vector.broadcast %27 : vector<1x128xf32> to vector<2x128xf32>
    %29 = arith.addf %26, %28 : vector<2x128xf32>
    %30 = vector.extract_strided_slice %29 {offsets = [0, 0], sizes = [1, 32], strides = [1, 1]} : vector<2x128xf32> to vector<1x32xf32>
    %31 = vector.extract_strided_slice %29 {offsets = [0, 64], sizes = [1, 32], strides = [1, 1]} : vector<2x128xf32> to vector<1x32xf32>
    %32 = vector.extract_strided_slice %29 {offsets = [1, 0], sizes = [1, 32], strides = [1, 1]} : vector<2x128xf32> to vector<1x32xf32>
    %33 = vector.extract_strided_slice %29 {offsets = [1, 64], sizes = [1, 32], strides = [1, 1]} : vector<2x128xf32> to vector<1x32xf32>
    %34 = tpu.concatenate %30, %32 in 1 : vector<1x32xf32>, vector<1x32xf32> -> vector<1x64xf32>
    %35 = tpu.concatenate %31, %33 in 1 : vector<1x32xf32>, vector<1x32xf32> -> vector<1x64xf32>
    %36 = vector.extract_strided_slice %29 {offsets = [0, 32], sizes = [1, 32], strides = [1, 1]} : vector<2x128xf32> to vector<1x32xf32>
    %37 = vector.extract_strided_slice %29 {offsets = [0, 96], sizes = [1, 32], strides = [1, 1]} : vector<2x128xf32> to vector<1x32xf32>
    %38 = vector.extract_strided_slice %29 {offsets = [1, 32], sizes = [1, 32], strides = [1, 1]} : vector<2x128xf32> to vector<1x32xf32>
    %39 = vector.extract_strided_slice %29 {offsets = [1, 96], sizes = [1, 32], strides = [1, 1]} : vector<2x128xf32> to vector<1x32xf32>
    %40 = tpu.concatenate %36, %38 in 1 : vector<1x32xf32>, vector<1x32xf32> -> vector<1x64xf32>
    %41 = tpu.concatenate %37, %39 in 1 : vector<1x32xf32>, vector<1x32xf32> -> vector<1x64xf32>
    %42 = tpu.iota {dimensions = array<i32: 0>} : vector<2x64xi32>
    %c1_i32 = arith.constant 1 : i32
    %43 = vector.broadcast %c1_i32 : i32 to vector<2x64xi32>
    %44 = arith.cmpi eq, %42, %43 : vector<2x64xi32>
    %45 = vector.shape_cast %40 : vector<1x64xf32> to vector<1x64xf32>
    %46 = vector.broadcast %45 : vector<1x64xf32> to vector<2x64xf32>
    %47 = vector.shape_cast %34 : vector<1x64xf32> to vector<1x64xf32>
    %48 = vector.broadcast %47 : vector<1x64xf32> to vector<2x64xf32>
    %49 = arith.select %44, %46, %48 : vector<2x64xi1>, vector<2x64xf32>
    %c1_i32_14 = arith.constant 1 : i32
    %50 = vector.broadcast %c1_i32_14 : i32 to vector<2x64xi32>
    %51 = arith.cmpi eq, %42, %50 : vector<2x64xi32>
    %52 = vector.shape_cast %41 : vector<1x64xf32> to vector<1x64xf32>
    %53 = vector.broadcast %52 : vector<1x64xf32> to vector<2x64xf32>
    %54 = vector.shape_cast %35 : vector<1x64xf32> to vector<1x64xf32>
    %55 = vector.broadcast %54 : vector<1x64xf32> to vector<2x64xf32>
    %56 = arith.select %51, %53, %55 : vector<2x64xi1>, vector<2x64xf32>
    %c0_15 = arith.constant 0 : index
    %c0_16 = arith.constant 0 : index
    %57 = vector.load %arg5[%c0_15, %c0_16] : memref<8x256xf32, #tpu.memory_space<vmem>>, vector<8x256xf32>
    %cst_17 = arith.constant dense<0.000000e+00> : vector<2x256xf32>
    %58 = tpu.matmul %24, %57, %cst_17 {dimension_numbers = #tpu.dot_dimension_numbers<[1], [0], [0], [1], [0, 0, 1, 1], [], []>} : vector<2x8xf32>, vector<8x256xf32>, vector<2x256xf32> -> vector<2x256xf32>
    %c0_18 = arith.constant 0 : index
    %c0_19 = arith.constant 0 : index
    %59 = vector.load %arg6[%c0_18, %c0_19] : memref<1x256xf32, #tpu.memory_space<vmem>>, vector<1x256xf32>
    %60 = vector.broadcast %59 : vector<1x256xf32> to vector<2x256xf32>
    %61 = arith.addf %58, %60 : vector<2x256xf32>
    %c0_20 = arith.constant 0 : index
    %c0_21 = arith.constant 0 : index
    %62 = vector.load %arg7[%c0_20, %c0_21] : memref<64x256xf32, #tpu.memory_space<vmem>>, vector<64x256xf32>
    %cst_22 = arith.constant dense<0.000000e+00> : vector<2x256xf32>
    %63 = tpu.matmul %49, %62, %cst_22 {dimension_numbers = #tpu.dot_dimension_numbers<[1], [0], [0], [1], [0, 0, 1, 1], [], []>} : vector<2x64xf32>, vector<64x256xf32>, vector<2x256xf32> -> vector<2x256xf32>
    %64 = arith.addf %63, %61 : vector<2x256xf32>
    %65 = vector.extract_strided_slice %64 {offsets = [0, 0], sizes = [2, 32], strides = [1, 1]} : vector<2x256xf32> to vector<2x32xf32>
    %66 = arith.negf %65 : vector<2x32xf32>
    %67 = math.exp %66 : vector<2x32xf32>
    %cst_23 = arith.constant 1.000000e+00 : f32
    %68 = vector.broadcast %cst_23 : f32 to vector<2x32xf32>
    %69 = arith.addf %68, %67 : vector<2x32xf32>
    %70 = arith.divf %68, %69 : vector<2x32xf32>
    %71 = vector.extract_strided_slice %64 {offsets = [0, 64], sizes = [2, 32], strides = [1, 1]} : vector<2x256xf32> to vector<2x32xf32>
    %72 = arith.negf %71 : vector<2x32xf32>
    %73 = math.exp %72 : vector<2x32xf32>
    %cst_24 = arith.constant 1.000000e+00 : f32
    %74 = vector.broadcast %cst_24 : f32 to vector<2x32xf32>
    %75 = arith.addf %74, %73 : vector<2x32xf32>
    %76 = arith.divf %74, %75 : vector<2x32xf32>
    %77 = vector.extract_strided_slice %64 {offsets = [0, 128], sizes = [2, 32], strides = [1, 1]} : vector<2x256xf32> to vector<2x32xf32>
    %78 = arith.negf %77 : vector<2x32xf32>
    %79 = math.exp %78 : vector<2x32xf32>
    %cst_25 = arith.constant 1.000000e+00 : f32
    %80 = vector.broadcast %cst_25 : f32 to vector<2x32xf32>
    %81 = arith.addf %80, %79 : vector<2x32xf32>
    %82 = arith.divf %80, %81 : vector<2x32xf32>
    %83 = vector.extract_strided_slice %64 {offsets = [0, 192], sizes = [2, 32], strides = [1, 1]} : vector<2x256xf32> to vector<2x32xf32>
    %84 = math.tanh %83 : vector<2x32xf32>
    %85 = vector.extract_strided_slice %56 {offsets = [0, 0], sizes = [2, 32], strides = [1, 1]} : vector<2x64xf32> to vector<2x32xf32>
    %86 = arith.mulf %76, %85 : vector<2x32xf32>
    %87 = arith.mulf %70, %84 : vector<2x32xf32>
    %88 = arith.addf %86, %87 : vector<2x32xf32>
    %89 = math.tanh %88 : vector<2x32xf32>
    %90 = arith.mulf %82, %89 : vector<2x32xf32>
    %91 = vector.extract_strided_slice %49 {offsets = [0, 32], sizes = [2, 32], strides = [1, 1]} : vector<2x64xf32> to vector<2x32xf32>
    %92 = tpu.concatenate %90, %91 in 1 : vector<2x32xf32>, vector<2x32xf32> -> vector<2x64xf32>
    %93 = vector.extract_strided_slice %56 {offsets = [0, 32], sizes = [2, 32], strides = [1, 1]} : vector<2x64xf32> to vector<2x32xf32>
    %94 = tpu.concatenate %88, %93 in 1 : vector<2x32xf32>, vector<2x32xf32> -> vector<2x64xf32>
    %cst_26 = arith.constant dense<0.000000e+00> : vector<2x256xf32>
    %95 = tpu.matmul %92, %62, %cst_26 {dimension_numbers = #tpu.dot_dimension_numbers<[1], [0], [0], [1], [0, 0, 1, 1], [], []>} : vector<2x64xf32>, vector<64x256xf32>, vector<2x256xf32> -> vector<2x256xf32>
    %96 = arith.addf %95, %61 : vector<2x256xf32>
    %97 = vector.extract_strided_slice %96 {offsets = [0, 0], sizes = [2, 192], strides = [1, 1]} : vector<2x256xf32> to vector<2x192xf32>
    %98 = arith.negf %97 : vector<2x192xf32>
    %99 = math.exp %98 : vector<2x192xf32>
    %cst_27 = arith.constant 1.000000e+00 : f32
    %100 = vector.broadcast %cst_27 : f32 to vector<2x192xf32>
    %101 = arith.addf %100, %99 : vector<2x192xf32>
    %102 = arith.divf %100, %101 : vector<2x192xf32>
    %103 = vector.extract_strided_slice %96 {offsets = [0, 192], sizes = [2, 64], strides = [1, 1]} : vector<2x256xf32> to vector<2x64xf32>
    %104 = math.tanh %103 : vector<2x64xf32>
    %105 = vector.extract_strided_slice %102 {offsets = [0, 64], sizes = [2, 64], strides = [1, 1]} : vector<2x192xf32> to vector<2x64xf32>
    %106 = arith.mulf %105, %94 : vector<2x64xf32>
    %107 = vector.extract_strided_slice %102 {offsets = [0, 0], sizes = [2, 64], strides = [1, 1]} : vector<2x192xf32> to vector<2x64xf32>
    %108 = arith.mulf %107, %104 : vector<2x64xf32>
    %109 = arith.addf %106, %108 : vector<2x64xf32>
    %110 = vector.extract_strided_slice %102 {offsets = [0, 128], sizes = [2, 64], strides = [1, 1]} : vector<2x192xf32> to vector<2x64xf32>
    %111 = math.tanh %109 : vector<2x64xf32>
    %112 = arith.mulf %110, %111 : vector<2x64xf32>
    %cst_28 = arith.constant dense<0.000000e+00> : vector<2x256xf32>
    %113 = tpu.matmul %112, %62, %cst_28 {dimension_numbers = #tpu.dot_dimension_numbers<[1], [0], [0], [1], [0, 0, 1, 1], [], []>} : vector<2x64xf32>, vector<64x256xf32>, vector<2x256xf32> -> vector<2x256xf32>
    %114 = arith.addf %113, %61 : vector<2x256xf32>
    %115 = vector.extract_strided_slice %114 {offsets = [0, 0], sizes = [2, 192], strides = [1, 1]} : vector<2x256xf32> to vector<2x192xf32>
    %116 = arith.negf %115 : vector<2x192xf32>
    %117 = math.exp %116 : vector<2x192xf32>
    %cst_29 = arith.constant 1.000000e+00 : f32
    %118 = vector.broadcast %cst_29 : f32 to vector<2x192xf32>
    %119 = arith.addf %118, %117 : vector<2x192xf32>
    %120 = arith.divf %118, %119 : vector<2x192xf32>
    %121 = vector.extract_strided_slice %114 {offsets = [0, 192], sizes = [2, 64], strides = [1, 1]} : vector<2x256xf32> to vector<2x64xf32>
    %122 = math.tanh %121 : vector<2x64xf32>
    %123 = vector.extract_strided_slice %120 {offsets = [0, 64], sizes = [2, 64], strides = [1, 1]} : vector<2x192xf32> to vector<2x64xf32>
    %124 = arith.mulf %123, %109 : vector<2x64xf32>
    %125 = vector.extract_strided_slice %120 {offsets = [0, 0], sizes = [2, 64], strides = [1, 1]} : vector<2x192xf32> to vector<2x64xf32>
    %126 = arith.mulf %125, %122 : vector<2x64xf32>
    %127 = arith.addf %124, %126 : vector<2x64xf32>
    %128 = vector.extract_strided_slice %120 {offsets = [0, 128], sizes = [2, 64], strides = [1, 1]} : vector<2x192xf32> to vector<2x64xf32>
    %129 = math.tanh %127 : vector<2x64xf32>
    %130 = arith.mulf %128, %129 : vector<2x64xf32>
    %cst_30 = arith.constant dense<0.000000e+00> : vector<2x256xf32>
    %131 = tpu.matmul %130, %62, %cst_30 {dimension_numbers = #tpu.dot_dimension_numbers<[1], [0], [0], [1], [0, 0, 1, 1], [], []>} : vector<2x64xf32>, vector<64x256xf32>, vector<2x256xf32> -> vector<2x256xf32>
    %132 = arith.addf %131, %61 : vector<2x256xf32>
    %133 = vector.extract_strided_slice %132 {offsets = [0, 0], sizes = [2, 192], strides = [1, 1]} : vector<2x256xf32> to vector<2x192xf32>
    %134 = arith.negf %133 : vector<2x192xf32>
    %135 = math.exp %134 : vector<2x192xf32>
    %cst_31 = arith.constant 1.000000e+00 : f32
    %136 = vector.broadcast %cst_31 : f32 to vector<2x192xf32>
    %137 = arith.addf %136, %135 : vector<2x192xf32>
    %138 = arith.divf %136, %137 : vector<2x192xf32>
    %139 = vector.extract_strided_slice %132 {offsets = [0, 192], sizes = [2, 64], strides = [1, 1]} : vector<2x256xf32> to vector<2x64xf32>
    %140 = math.tanh %139 : vector<2x64xf32>
    %141 = vector.extract_strided_slice %138 {offsets = [0, 64], sizes = [2, 64], strides = [1, 1]} : vector<2x192xf32> to vector<2x64xf32>
    %142 = arith.mulf %141, %127 : vector<2x64xf32>
    %143 = vector.extract_strided_slice %138 {offsets = [0, 0], sizes = [2, 64], strides = [1, 1]} : vector<2x192xf32> to vector<2x64xf32>
    %144 = arith.mulf %143, %140 : vector<2x64xf32>
    %145 = arith.addf %142, %144 : vector<2x64xf32>
    %146 = vector.extract_strided_slice %138 {offsets = [0, 128], sizes = [2, 64], strides = [1, 1]} : vector<2x192xf32> to vector<2x64xf32>
    %147 = math.tanh %145 : vector<2x64xf32>
    %148 = arith.mulf %146, %147 : vector<2x64xf32>
    %cst_32 = arith.constant dense<0.000000e+00> : vector<2x256xf32>
    %149 = tpu.matmul %148, %62, %cst_32 {dimension_numbers = #tpu.dot_dimension_numbers<[1], [0], [0], [1], [0, 0, 1, 1], [], []>} : vector<2x64xf32>, vector<64x256xf32>, vector<2x256xf32> -> vector<2x256xf32>
    %150 = arith.addf %149, %61 : vector<2x256xf32>
    %151 = vector.extract_strided_slice %150 {offsets = [0, 0], sizes = [2, 192], strides = [1, 1]} : vector<2x256xf32> to vector<2x192xf32>
    %152 = arith.negf %151 : vector<2x192xf32>
    %153 = math.exp %152 : vector<2x192xf32>
    %cst_33 = arith.constant 1.000000e+00 : f32
    %154 = vector.broadcast %cst_33 : f32 to vector<2x192xf32>
    %155 = arith.addf %154, %153 : vector<2x192xf32>
    %156 = arith.divf %154, %155 : vector<2x192xf32>
    %157 = vector.extract_strided_slice %150 {offsets = [0, 192], sizes = [2, 64], strides = [1, 1]} : vector<2x256xf32> to vector<2x64xf32>
    %158 = math.tanh %157 : vector<2x64xf32>
    %159 = vector.extract_strided_slice %156 {offsets = [0, 64], sizes = [2, 64], strides = [1, 1]} : vector<2x192xf32> to vector<2x64xf32>
    %160 = arith.mulf %159, %145 : vector<2x64xf32>
    %161 = vector.extract_strided_slice %156 {offsets = [0, 0], sizes = [2, 64], strides = [1, 1]} : vector<2x192xf32> to vector<2x64xf32>
    %162 = arith.mulf %161, %158 : vector<2x64xf32>
    %163 = arith.addf %160, %162 : vector<2x64xf32>
    %164 = vector.extract_strided_slice %156 {offsets = [0, 128], sizes = [2, 64], strides = [1, 1]} : vector<2x192xf32> to vector<2x64xf32>
    %165 = math.tanh %163 : vector<2x64xf32>
    %166 = arith.mulf %164, %165 : vector<2x64xf32>
    %cst_34 = arith.constant dense<0.000000e+00> : vector<2x256xf32>
    %167 = tpu.matmul %166, %62, %cst_34 {dimension_numbers = #tpu.dot_dimension_numbers<[1], [0], [0], [1], [0, 0, 1, 1], [], []>} : vector<2x64xf32>, vector<64x256xf32>, vector<2x256xf32> -> vector<2x256xf32>
    %168 = arith.addf %167, %61 : vector<2x256xf32>
    %169 = vector.extract_strided_slice %168 {offsets = [0, 0], sizes = [2, 192], strides = [1, 1]} : vector<2x256xf32> to vector<2x192xf32>
    %170 = arith.negf %169 : vector<2x192xf32>
    %171 = math.exp %170 : vector<2x192xf32>
    %cst_35 = arith.constant 1.000000e+00 : f32
    %172 = vector.broadcast %cst_35 : f32 to vector<2x192xf32>
    %173 = arith.addf %172, %171 : vector<2x192xf32>
    %174 = arith.divf %172, %173 : vector<2x192xf32>
    %175 = vector.extract_strided_slice %168 {offsets = [0, 192], sizes = [2, 64], strides = [1, 1]} : vector<2x256xf32> to vector<2x64xf32>
    %176 = math.tanh %175 : vector<2x64xf32>
    %177 = vector.extract_strided_slice %174 {offsets = [0, 64], sizes = [2, 64], strides = [1, 1]} : vector<2x192xf32> to vector<2x64xf32>
    %178 = arith.mulf %177, %163 : vector<2x64xf32>
    %179 = vector.extract_strided_slice %174 {offsets = [0, 0], sizes = [2, 64], strides = [1, 1]} : vector<2x192xf32> to vector<2x64xf32>
    %180 = arith.mulf %179, %176 : vector<2x64xf32>
    %181 = arith.addf %178, %180 : vector<2x64xf32>
    %182 = vector.extract_strided_slice %174 {offsets = [0, 128], sizes = [2, 64], strides = [1, 1]} : vector<2x192xf32> to vector<2x64xf32>
    %183 = math.tanh %181 : vector<2x64xf32>
    %184 = arith.mulf %182, %183 : vector<2x64xf32>
    %cst_36 = arith.constant dense<0.000000e+00> : vector<2x256xf32>
    %185 = tpu.matmul %184, %62, %cst_36 {dimension_numbers = #tpu.dot_dimension_numbers<[1], [0], [0], [1], [0, 0, 1, 1], [], []>} : vector<2x64xf32>, vector<64x256xf32>, vector<2x256xf32> -> vector<2x256xf32>
    %186 = arith.addf %185, %61 : vector<2x256xf32>
    %187 = vector.extract_strided_slice %186 {offsets = [0, 0], sizes = [2, 192], strides = [1, 1]} : vector<2x256xf32> to vector<2x192xf32>
    %188 = arith.negf %187 : vector<2x192xf32>
    %189 = math.exp %188 : vector<2x192xf32>
    %cst_37 = arith.constant 1.000000e+00 : f32
    %190 = vector.broadcast %cst_37 : f32 to vector<2x192xf32>
    %191 = arith.addf %190, %189 : vector<2x192xf32>
    %192 = arith.divf %190, %191 : vector<2x192xf32>
    %193 = vector.extract_strided_slice %186 {offsets = [0, 192], sizes = [2, 64], strides = [1, 1]} : vector<2x256xf32> to vector<2x64xf32>
    %194 = math.tanh %193 : vector<2x64xf32>
    %195 = vector.extract_strided_slice %192 {offsets = [0, 64], sizes = [2, 64], strides = [1, 1]} : vector<2x192xf32> to vector<2x64xf32>
    %196 = arith.mulf %195, %181 : vector<2x64xf32>
    %197 = vector.extract_strided_slice %192 {offsets = [0, 0], sizes = [2, 64], strides = [1, 1]} : vector<2x192xf32> to vector<2x64xf32>
    %198 = arith.mulf %197, %194 : vector<2x64xf32>
    %199 = arith.addf %196, %198 : vector<2x64xf32>
    %200 = vector.extract_strided_slice %192 {offsets = [0, 128], sizes = [2, 64], strides = [1, 1]} : vector<2x192xf32> to vector<2x64xf32>
    %201 = math.tanh %199 : vector<2x64xf32>
    %202 = arith.mulf %200, %201 : vector<2x64xf32>
    %cst_38 = arith.constant dense<0.000000e+00> : vector<2x256xf32>
    %203 = tpu.matmul %202, %62, %cst_38 {dimension_numbers = #tpu.dot_dimension_numbers<[1], [0], [0], [1], [0, 0, 1, 1], [], []>} : vector<2x64xf32>, vector<64x256xf32>, vector<2x256xf32> -> vector<2x256xf32>
    %204 = arith.addf %203, %61 : vector<2x256xf32>
    %205 = vector.extract_strided_slice %204 {offsets = [0, 0], sizes = [2, 192], strides = [1, 1]} : vector<2x256xf32> to vector<2x192xf32>
    %206 = arith.negf %205 : vector<2x192xf32>
    %207 = math.exp %206 : vector<2x192xf32>
    %cst_39 = arith.constant 1.000000e+00 : f32
    %208 = vector.broadcast %cst_39 : f32 to vector<2x192xf32>
    %209 = arith.addf %208, %207 : vector<2x192xf32>
    %210 = arith.divf %208, %209 : vector<2x192xf32>
    %211 = vector.extract_strided_slice %204 {offsets = [0, 192], sizes = [2, 64], strides = [1, 1]} : vector<2x256xf32> to vector<2x64xf32>
    %212 = math.tanh %211 : vector<2x64xf32>
    %213 = vector.extract_strided_slice %210 {offsets = [0, 64], sizes = [2, 64], strides = [1, 1]} : vector<2x192xf32> to vector<2x64xf32>
    %214 = arith.mulf %213, %199 : vector<2x64xf32>
    %215 = vector.extract_strided_slice %210 {offsets = [0, 0], sizes = [2, 64], strides = [1, 1]} : vector<2x192xf32> to vector<2x64xf32>
    %216 = arith.mulf %215, %212 : vector<2x64xf32>
    %217 = arith.addf %214, %216 : vector<2x64xf32>
    %218 = vector.extract_strided_slice %210 {offsets = [0, 128], sizes = [2, 64], strides = [1, 1]} : vector<2x192xf32> to vector<2x64xf32>
    %219 = math.tanh %217 : vector<2x64xf32>
    %220 = arith.mulf %218, %219 : vector<2x64xf32>
    %cst_40 = arith.constant dense<0.000000e+00> : vector<2x256xf32>
    %221 = tpu.matmul %220, %62, %cst_40 {dimension_numbers = #tpu.dot_dimension_numbers<[1], [0], [0], [1], [0, 0, 1, 1], [], []>} : vector<2x64xf32>, vector<64x256xf32>, vector<2x256xf32> -> vector<2x256xf32>
    %222 = arith.addf %221, %61 : vector<2x256xf32>
    %223 = vector.extract_strided_slice %222 {offsets = [0, 0], sizes = [2, 192], strides = [1, 1]} : vector<2x256xf32> to vector<2x192xf32>
    %224 = arith.negf %223 : vector<2x192xf32>
    %225 = math.exp %224 : vector<2x192xf32>
    %cst_41 = arith.constant 1.000000e+00 : f32
    %226 = vector.broadcast %cst_41 : f32 to vector<2x192xf32>
    %227 = arith.addf %226, %225 : vector<2x192xf32>
    %228 = arith.divf %226, %227 : vector<2x192xf32>
    %229 = vector.extract_strided_slice %222 {offsets = [0, 192], sizes = [2, 64], strides = [1, 1]} : vector<2x256xf32> to vector<2x64xf32>
    %230 = math.tanh %229 : vector<2x64xf32>
    %231 = vector.extract_strided_slice %228 {offsets = [0, 64], sizes = [2, 64], strides = [1, 1]} : vector<2x192xf32> to vector<2x64xf32>
    %232 = arith.mulf %231, %217 : vector<2x64xf32>
    %233 = vector.extract_strided_slice %228 {offsets = [0, 0], sizes = [2, 64], strides = [1, 1]} : vector<2x192xf32> to vector<2x64xf32>
    %234 = arith.mulf %233, %230 : vector<2x64xf32>
    %235 = arith.addf %232, %234 : vector<2x64xf32>
    %236 = vector.extract_strided_slice %228 {offsets = [0, 128], sizes = [2, 64], strides = [1, 1]} : vector<2x192xf32> to vector<2x64xf32>
    %237 = math.tanh %235 : vector<2x64xf32>
    %238 = arith.mulf %236, %237 : vector<2x64xf32>
    %239 = tpu.concatenate %112, %130, %148, %166, %184, %202, %220, %238 in 1 : vector<2x64xf32>, vector<2x64xf32>, vector<2x64xf32>, vector<2x64xf32>, vector<2x64xf32>, vector<2x64xf32>, vector<2x64xf32>, vector<2x64xf32> -> vector<2x512xf32>
    %c0_42 = arith.constant 0 : index
    %c0_43 = arith.constant 0 : index
    %240 = vector.load %arg8[%c0_42, %c0_43] : memref<512x128xf32, #tpu.memory_space<vmem>>, vector<512x128xf32>
    %cst_44 = arith.constant dense<0.000000e+00> : vector<2x128xf32>
    %241 = tpu.matmul %239, %240, %cst_44 {dimension_numbers = #tpu.dot_dimension_numbers<[1], [0], [0], [1], [0, 0, 1, 1], [], []>} : vector<2x512xf32>, vector<512x128xf32>, vector<2x128xf32> -> vector<2x128xf32>
    %c0_45 = arith.constant 0 : index
    %c0_46 = arith.constant 0 : index
    %242 = vector.load %arg9[%c0_45, %c0_46] : memref<1x128xf32, #tpu.memory_space<vmem>>, vector<1x128xf32>
    %243 = vector.broadcast %242 : vector<1x128xf32> to vector<2x128xf32>
    %244 = arith.addf %241, %243 : vector<2x128xf32>
    %c0_47 = arith.constant 0 : index
    %c0_48 = arith.constant 0 : index
    %245 = vector.load %arg10[%c0_47, %c0_48] : memref<2x128xf32, #tpu.memory_space<vmem>>, vector<2x128xf32>
    tpu.vector_store %arg10[%c0_47, %c0_48], %244 {strides = array<i32>} : memref<2x128xf32, #tpu.memory_space<vmem>>, vector<2x128xf32>,
    return
  }
}

</mosaic_0001>

<bundles_post_ra>
// kernel: tpu_custom_call.1
= control target key start
LH: loop header
LB: loop body
LE: loop exit
PB: predicated region body
PF: predicated region fallthrough
CT: control target
= control target key end

     0   :  { %15 = vsyncpa [#allocation3], 0  ;;  %s2216_s0 = inlined_call_operand.hbm [shape: f32[2,8], index: 0, kind: input, shape index: {}]   ;;  %s2217_s1 = inlined_call_operand.hbm [shape: f32[1,8], index: 1, kind: input, shape index: {}]   ;;  %s2218_s2 = inlined_call_operand.vmem [shape: f32[1,8], index: 2, kind: input, shape index: {}]   ;;  %s2219_s3 = inlined_call_operand.hbm [shape: f32[8,128], index: 3, kind: input, shape index: {}]   ;;  %s2220_s4 = inlined_call_operand.hbm [shape: f32[1,128], index: 4, kind: input, shape index: {}]   ;;  %s2221_s5 = inlined_call_operand.hbm [shape: f32[8,256], index: 5, kind: input, shape index: {}]   ;;  %s2222_s6 = inlined_call_operand.vmem [shape: f32[1,256], index: 6, kind: input, shape index: {}]   ;;  %s2223_s7 = inlined_call_operand.hbm [shape: f32[64,256], index: 7, kind: input, shape index: {}]   ;;  %s2224_s8 = inlined_call_operand.hbm [shape: f32[512,128], index: 8, kind: input, shape index: {}]   ;;  %s2225_s9 = inlined_call_operand.vmem [shape: f32[1,128], index: 9, kind: input, shape index: {}]   ;;  %s2226_s10 = inlined_call_operand.hbm [shape: f32[2,128], index: 10, kind: output, shape index: {}]  }
   0x1   :  { %16 = vsyncpa [#allocation6], 0 }
   0x2   :  { %17 = vsyncpa [#allocation9], 0 }
   0x3   :  { %18 = vsyncpa [#allocation12], 0  ;;  %s36_s15 = sshll.u32 %s2217_s1, 4  ;;  %s37_s15 = int_to_ptr.hbm [resolvable:$true] %s36_s15 }
   0x4   :  { %19 = vsyncpa [#allocation4], 0  ;;  %s1774_s16 = smov [#allocation5]   ;;  %s60_s20 = sshll.u32 %s2220_s4, 4  ;;  %s61_s20 = int_to_ptr.hbm [resolvable:$true] %s60_s20 }
   0x5   :  { %s38_s17 = sshll.u32 %s1774_s16, 4  ;;  %s1775_s21 = smov [#allocation8]   ;;  %s39_s17 = int_to_ptr.vmem [resolvable:$true] %s38_s17 }
   0x6   :  { %41 = dma.hbm_to_vmem [thread:$0]  %s37_s15, 16, %s39_s17, [#allocation6]  }
   0x7   :  { %s62_s22 = sshll.u32 %s1775_s21, 4  ;;  %s83_s25 = sshll.u32 %s2223_s7, 4  ;;  %s63_s22 = int_to_ptr.vmem [resolvable:$true] %s62_s22  ;;  %s84_s25 = int_to_ptr.hbm [resolvable:$true] %s83_s25 }
   0x8   :  { %65 = dma.hbm_to_vmem [thread:$0]  %s61_s20, 16, %s63_s22, [#allocation9]  }
   0x9   :  { %s1776_s1 = smov [#allocation11]   ;;  %s25_s29 = sshll.u32 %s2216_s0, 4  ;;  %s26_s29 = int_to_ptr.hbm [resolvable:$true] %s25_s29 }
   0xa   :  { %s85_s26 = sshll.u32 %s1776_s1, 4  ;;  %s1777_s30 = smov 256   ;;  %s86_s26 = int_to_ptr.vmem [resolvable:$true] %s85_s26 }
   0xb   :  { %s1778_s4 = smov 16   ;;  %s1779_s11 = smov [#allocation2]  }
   0xc   :  { %91 = dma.hbm_to_vmem [thread:$0]  %s84_s25, 2048, %s86_s26, [#allocation12], %s1777_s30, %s1777_s30, %s1778_s4  }
   0xd   :  { %s27_s12 = sshll.u32 %s1779_s11, 4  ;;  %s49_s7 = sshll.u32 %s2219_s3, 4  ;;  %s28_s12 = int_to_ptr.vmem [resolvable:$true] %s27_s12  ;;  %s50_s7 = int_to_ptr.hbm [resolvable:$true] %s49_s7 }
   0xe   :  { %30 = dma.hbm_to_vmem [thread:$0]  %s26_s29, 32, %s28_s12, [#allocation3]  }
   0xf   :  { %s71_s17 = sshll.u32 %s2221_s5, 4  ;;  %s1780_s18 = smov [#allocation7]   ;;  %s72_s17 = int_to_ptr.hbm [resolvable:$true] %s71_s17 }
  0x10   :  { %s51_s19 = sshll.u32 %s1780_s18, 4  ;;  %s1781_s0 = smov [#allocation10]   ;;  %s52_s19 = int_to_ptr.vmem [resolvable:$true] %s51_s19 }
  0x11   :  { %54 = dma.hbm_to_vmem [thread:$0]  %s50_s7, 128, %s52_s19, [#allocation6]  }
  0x12   :  { %s73_s20 = sshll.u32 %s1781_s0, 4  ;;  %s96_s23 = sshll.u32 %s2224_s8, 4  ;;  %s74_s20 = int_to_ptr.vmem [resolvable:$true] %s73_s20  ;;  %s97_s23 = int_to_ptr.hbm [resolvable:$true] %s96_s23 }
  0x13   :  { %76 = dma.hbm_to_vmem [thread:$0]  %s72_s17, 256, %s74_s20, [#allocation9]  }
  0x14   :  { %s1782_s3 = smov [#allocation13]   ;;  %s1783_s25 = smov 128  }
  0x15   :  { %s98_s24 = sshll.u32 %s1782_s3, 4  ;;  %s1784_s1 = smov 8   ;;  %s99_s24 = int_to_ptr.vmem [resolvable:$true] %s98_s24 }
  0x16   :  { %104 = dma.hbm_to_vmem [thread:$0]  %s97_s23, 8192, %s99_s24, [#allocation12], %s1783_s25, %s1783_s25, %s1784_s1  }
  0x17   :  { %1764 = dma.done.wait [#allocation3], 32  }
  0x18   :  { %1765 = vsyncadd [#allocation3], 4294967264 }
  0x19   :  { %1766 = dma.done.wait [#allocation6], 144  }
  0x1a   :  { %1767 = vsyncadd [#allocation6], 4294967152 }
  0x1b   :  { %1768 = dma.done.wait [#allocation9], 272  }
  0x1c   :  { %1769 = vsyncadd [#allocation9], 4294967024 }
  0x1d   :  { %1770 = dma.done.wait [#allocation12], 10240  }
  0x1e   :  { %1771 = vsyncadd [#allocation12], 4294957056  ;;  %vm136_vm0 = vcmask 58368   ;;  %v135_v0 = vld [vmem:[#allocation2] sm:$0x3]  ;;  %v1785_v2 = vmov 8.0   ;;  %v231_v53 = vlaneseq }
  0x1f   :  { %v137_v1 = vsel %vm136_vm0, %v135_v0, 0.0  ;;  %1460 = vrcp.f32 %v1785_v2  ;;  %v176_v14 = vld [vmem:[#allocation7] sm:$0xff]  ;;  %v241_v15 = vld [vmem:[#allocation10 + $0x8] sm:$0xff]  ;;  %v240_v16 = vld [vmem:[#allocation10] sm:$0xff]  ;;  %vm181_vm5 = vcmask 64512   ;;  %s1786_s26 = smov 32  }
  0x20   :  { %138 = vadd.xlane.f32.xlu0 %v137_v1  ;;  %200 = vmatpush.msra.mxu1 %v176_v14  ;;  %v1456_v26 = vld [vmem:[#allocation5] ss:$0 sm:$0xff]  ;;  %v1457_v29 = vld [vmem:[%s2218_s2] ss:$0 sm:$0xff]  ;;  %v1458_v32 = vld [vmem:[#allocation8] ss:$0 sm:$0xff] }
  0x21   :  { %283 = vmatpush.msra.mxu2 %v241_v15  ;;  %s1787_s27 = smov 64   ;;  %s1788_s2 = smov 96   ;;  %v1884_v36 = vld [vmem:[#allocation11 + $0x70] sm:$0xff]  ;;  %v1886_v37 = vld [vmem:[#allocation11 + $0x78] sm:$0xff]  ;;  %v1892_v38 = vld [vmem:[#allocation11 + $0x60] sm:$0xff]  ;;  %v232_v55 = vshrl.u32 %v231_v53, 7 }
  0x22   :  { %263 = vmatpush.msrb.mxu1 %v240_v16  ;;  %316 = vmatpush.msra.mxu3 %v1884_v36  ;;  %v1894_v39 = vld [vmem:[#allocation11 + $0x68] sm:$0xff]  ;;  %v1900_v40 = vld [vmem:[#allocation11 + $0x50] sm:$0xff]  ;;  %v1902_v41 = vld [vmem:[#allocation11 + $0x58] sm:$0xff]  ;;  %vm210_vm6 = vcmask 261120   ;;  %vm304_vm8 = vcmask 523264   ;;  %s1789_s4 = smov [#allocation14]  }
  0x23   :  { %336 = vmatpush.msra.mxu0 %v1886_v37  ;;  %445 = vmatpush.msrb.mxu2 %v1886_v37  ;;  %v1906_v42 = vld [vmem:[#allocation11 + $0x40] sm:$0xff]  ;;  %v1908_v43 = vld [vmem:[#allocation11 + $0x48] sm:$0xff]  ;;  %v1910_v44 = vld [vmem:[#allocation11 + $0x30] sm:$0xff]  ;;  %vm233_vm7 = vcmp.eq.s32.totalorder %v232_v55, 1  ;;  %s1381_s11 = sshll.u32 %s1789_s4, 4  ;;  %s1383_s14 = sshll.u32 %s2226_s10, 4  ;;  %s1382_s11 = int_to_ptr.vmem [resolvable:$true] %s1381_s11  ;;  %s1384_s14 = int_to_ptr.hbm [resolvable:$true] %s1383_s14 }
  0x24   :  { %317 = vmatpush.msra.mxu3 %v1892_v38  ;;  %v1912_v45 = vld [vmem:[#allocation11 + $0x38] sm:$0xff]  ;;  %v1918_v46 = vld [vmem:[#allocation11 + $0x20] sm:$0xff]  ;;  %v1920_v47 = vld [vmem:[#allocation11 + $0x28] sm:$0xff] }
  0x25   :  { %v1461_v3 = vpop.eup %1460  ;;  %337 = vmatpush.msra.mxu0 %v1894_v39  ;;  %446 = vmatpush.msrb.mxu2 %v1894_v39  ;;  %v1930_v48 = vld [vmem:[#allocation11 + $0x10] sm:$0xff]  ;;  %v1932_v49 = vld [vmem:[#allocation11 + $0x18] sm:$0xff]  ;;  %v1938_v50 = vld [vmem:[#allocation11] sm:$0xff] }
  0x26   :  { %v141_v4 = vmul.f32 8.0, %v1461_v3  ;;  %vm145_vm1 = vweird.f32 %v1461_v3  ;;  %318 = vmatpush.msra.mxu3 %v1900_v40  ;;  %v1940_v51 = vld [vmem:[#allocation11 + $0x8] sm:$0xff] }
  0x27   :  { %338 = vmatpush.msra.mxu0 %v1902_v41  ;;  %447 = vmatpush.msrb.mxu2 %v1902_v41 }
  0x28   :  { %v142_v5 = vsub.f32 1.0, %v141_v4  ;;  %319 = vmatpush.msra.mxu3 %v1906_v42 }
  0x29   :  { %339 = vmatpush.msra.mxu0 %v1908_v43  ;;  %448 = vmatpush.msrb.mxu2 %v1908_v43 }
  0x2a   :  { %v143_v6 = vmul.f32 %v1461_v3, %v142_v5  ;;  %320 = vmatpush.msra.mxu3 %v1910_v44 }
  0x2b   :  { %340 = vmatpush.msra.mxu0 %v1912_v45  ;;  %449 = vmatpush.msrb.mxu2 %v1912_v45 }
  0x2c   :  { %v144_v7 = vadd.f32 %v1461_v3, %v143_v6  ;;  %321 = vmatpush.msra.mxu3 %v1918_v46  ;;  %v242_v6 = vld [vmem:[%s2222_s6] sm:$0x3] }
  0x2d   :  { %341 = vmatpush.msra.mxu0 %v1920_v47  ;;  %450 = vmatpush.msrb.mxu2 %v1920_v47 }
  0x2e   :  { %v146_v8 = vsel %vm145_vm1, %v1461_v3, %v144_v7  ;;  %322 = vmatpush.msra.mxu3 %v1930_v48  ;;  %v245_v7 = vperm.slane %v242_v6, 1 }
  0x2f   :  { %342 = vmatpush.msra.mxu0 %v1932_v49  ;;  %451 = vmatpush.msrb.mxu2 %v1932_v49 }
  0x30   :  { %323 = vmatpush.msra.mxu3 %v1938_v50 }
  0x31   :  { %343 = vmatpush.msra.mxu0 %v1940_v51  ;;  %452 = vmatpush.msrb.mxu2 %v1940_v51 }
  0x32   :  { %528 = vmatpush.msrb.mxu3 %v1884_v36 }
  0x33   :  { %548 = vmatpush.msrb.mxu0 %v1886_v37 }
  0x34   :  { %529 = vmatpush.msrb.mxu3 %v1892_v38 }
  0x35   :  { %549 = vmatpush.msrb.mxu0 %v1894_v39 }
  0x36   :  { %530 = vmatpush.msrb.mxu3 %v1900_v40 }
  0x37   :  { %550 = vmatpush.msrb.mxu0 %v1902_v41 }
  0x38   :  { %531 = vmatpush.msrb.mxu3 %v1906_v42 }
  0x39   :  { %551 = vmatpush.msrb.mxu0 %v1908_v43 }
  0x3a   :  { %532 = vmatpush.msrb.mxu3 %v1910_v44 }
  0x3b   :  { %552 = vmatpush.msrb.mxu0 %v1912_v45 }
  0x3c   :  { %533 = vmatpush.msrb.mxu3 %v1918_v46 }
  0x3d   :  { %553 = vmatpush.msrb.mxu0 %v1920_v47 }
  0x3e   :  { %534 = vmatpush.msrb.mxu3 %v1930_v48 }
  0x3f   :  { %554 = vmatpush.msrb.mxu0 %v1932_v49 }
  0x40   :  { %535 = vmatpush.msrb.mxu3 %v1938_v50 }
  0x41   :  { %555 = vmatpush.msrb.mxu0 %v1940_v51 }
  0x93   :  { %v139_v9 = vpop.xlane.xlu0 %138 }
  0x94   :  { %v147_v10 = vmul.f32 %v146_v8, %v139_v9 }
  0x96   :  { %v148_v11 = vsub.f32 %v135_v0, %v147_v10 }
  0x98   :  { %v149_v12 = vmul.f32 %v148_v11, %v148_v11 }
  0x9a   :  { %v150_v13 = vsel %vm136_vm0, %v149_v12, 0.0 }
  0x9b   :  { %151 = vadd.xlane.f32.xlu0 %v150_v13  ;;  %v244_v13 = vperm.slane %v242_v6, 0 }
 0x10e   :  { %v152_v17 = vpop.xlane.xlu0 %151 }
 0x10f   :  { %v153_v18 = vmul.f32 %v152_v17, %v146_v8 }
 0x111   :  { %v154_v19 = vadd.f32 1e-05, %v153_v18 }
 0x113   :  { %1462 = vrsqrt.f32 %v154_v19  ;;  %vm161_vm3 = vweird.f32 %v154_v19 }
 0x119   :  { %v1463_v20 = vpop.eup %1462 }
 0x11a   :  { %v156_v21 = vmul.f32 %v1463_v20, %v154_v19  ;;  %vm162_vm2 = vweird.f32 %v1463_v20 }
 0x11b   :  { %vm163_vm4 = vmor %vm161_vm3, %vm162_vm2 }
 0x11c   :  { %v157_v22 = vmul.f32 %v1463_v20, %v156_v21 }
 0x11e   :  { %v158_v23 = vmul.f32 0.5, %v157_v22 }
 0x120   :  { %v159_v24 = vsub.f32 1.5, %v158_v23 }
 0x122   :  { %v160_v25 = vmul.f32 %v1463_v20, %v159_v24 }
 0x124   :  { %v164_v27 = vsel %vm163_vm4, %v1463_v20, %v160_v25 }
 0x125   :  { %v165_v28 = vmul.f32 %v164_v27, %v148_v11 }
 0x127   :  { %v170_v30 = vmul.f32 %v1456_v26, %v165_v28 }
 0x129   :  { %v175_v31 = vadd.f32 %v1457_v29, %v170_v30 }
 0x12b   :  { %1396 = vmatmul.msk.f32.vlgmr.msra.gmra.mxu1 %vm181_vm5, %v175_v31  ;;  %1398 = vmatmul.msk.f32.vlgmr.msra.gmra.mxu2 %vm181_vm5, %v175_v31 }
 0x12c   :  { %425 = vmatpush.msra.mxu1 %v1884_v36  ;;  %647 = vmatpush.msra.mxu2 %v1886_v37 }
 0x12e   :  { %426 = vmatpush.msra.mxu1 %v1892_v38  ;;  %648 = vmatpush.msra.mxu2 %v1894_v39 }
 0x130   :  { %427 = vmatpush.msra.mxu1 %v1900_v40  ;;  %649 = vmatpush.msra.mxu2 %v1902_v41 }
 0x132   :  { %428 = vmatpush.msra.mxu1 %v1906_v42  ;;  %650 = vmatpush.msra.mxu2 %v1908_v43 }
 0x133   :  { %1397 = vmatmul.msk.f32.vlgmr.msrb.gmra.mxu1 %vm181_vm5, %v175_v31 }
 0x134   :  { %429 = vmatpush.msra.mxu1 %v1910_v44  ;;  %651 = vmatpush.msra.mxu2 %v1912_v45 }
 0x136   :  { %430 = vmatpush.msra.mxu1 %v1918_v46  ;;  %652 = vmatpush.msra.mxu2 %v1920_v47 }
 0x138   :  { %431 = vmatpush.msra.mxu1 %v1930_v48  ;;  %653 = vmatpush.msra.mxu2 %v1932_v49 }
 0x13a   :  { %432 = vmatpush.msra.mxu1 %v1938_v50  ;;  %654 = vmatpush.msra.mxu2 %v1940_v51 }
 0x13c   :  { %627 = vmatpush.msrb.mxu1 %v1884_v36 }
 0x13e   :  { %628 = vmatpush.msrb.mxu1 %v1892_v38 }
 0x140   :  { %629 = vmatpush.msrb.mxu1 %v1900_v40 }
 0x142   :  { %630 = vmatpush.msrb.mxu1 %v1906_v42 }
 0x144   :  { %631 = vmatpush.msrb.mxu1 %v1910_v44 }
 0x146   :  { %632 = vmatpush.msrb.mxu1 %v1918_v46 }
 0x148   :  { %633 = vmatpush.msrb.mxu1 %v1930_v48 }
 0x14a   :  { %634 = vmatpush.msrb.mxu1 %v1938_v50 }
 0x1a8   :  { %v202_v33 = vpop.f32.mrf.mxu1 }
 0x1a9   :  { %v1871_v34 = vadd.f32 %v1458_v32, %v202_v33 }
 0x1ab   :  { %224 = vrot.lane.b32.xlu0 %v1871_v34, %s1786_s26  ;;  %212 = vrot.lane.b32.xlu2 %v1871_v34, %s1787_s27  ;;  %v1877_v35 = vrot.slane %v1871_v34, 1 }
 0x1ad   :  { %207 = vrot.lane.b32.xlu1 %v1877_v35, %s1786_s26 }
 0x1ae   :  { %v285_v8 = vpop.f32.mrf.mxu2 }
 0x1af   :  { %v2014_v9 = vadd.f32 %v285_v8, %v245_v7 }
 0x1b0   :  { %v265_v14 = vpop.f32.mrf.mxu1 }
 0x1b1   :  { %v2018_v16 = vadd.f32 %v265_v14, %v244_v13 }
 0x1b3   :  { %215 = vrot.lane.b32.xlu2 %v1877_v35, %s1788_s2 }
 0x1b5   :  { %219 = vrot.lane.b32.xlu1 %v1871_v34, %s1788_s2 }
 0x1bd   :  { %227 = vrot.lane.b32.xlu1 %v1877_v35, %s1787_s27 }
 0x205   :  { %v213_v54 = vpop.permute.xlu2 %212 }
 0x20d   :  { %v216_v61 = vpop.permute.xlu2 %215 }
 0x20e   :  { %v218_v63 = vsel %vm210_vm6, %v213_v54, %v216_v61 }
 0x20f   :  { %v238_v3 = vperm.slane %v218_v63, 0 }
 0x21d   :  { %v225_v0 = vpop.permute.xlu0 %224 }
 0x21f   :  { %v208_v52 = vpop.permute.xlu1 %207 }
 0x220   :  { %v211_v56 = vsel %vm210_vm6, %v1871_v34, %v208_v52 }
 0x221   :  { %v235_v59 = vperm.slane %v211_v56, 0 }
 0x227   :  { %v220_v57 = vpop.permute.xlu1 %219 }
 0x228   :  { %v223_v58 = vsel %vm210_vm6, %v220_v57, %v1877_v35 }
 0x229   :  { %v234_v60 = vperm.slane %v223_v58, 0 }
 0x22b   :  { %v1985_v62 = vsel %vm233_vm7, %v234_v60, %v235_v59 }
 0x22c   :  { %1399 = vmatmul.msk.f32.vlgmr.msra.gmra.mxu3 %vm304_vm8, %v1985_v62  ;;  %1400 = vmatmul.msk.f32.vlgmr.msra.gmra.mxu0 %vm304_vm8, %v1985_v62 }
 0x22d   :  { %726 = vmatpush.msra.mxu3 %v1884_v36  ;;  %746 = vmatpush.msra.mxu0 %v1886_v37 }
 0x22f   :  { %v228_v1 = vpop.permute.xlu1 %227  ;;  %727 = vmatpush.msra.mxu3 %v1892_v38  ;;  %747 = vmatpush.msra.mxu0 %v1894_v39 }
 0x230   :  { %v230_v2 = vsel %vm210_vm6, %v225_v0, %v228_v1 }
 0x231   :  { %v237_v4 = vperm.slane %v230_v2, 0  ;;  %728 = vmatpush.msra.mxu3 %v1900_v40  ;;  %748 = vmatpush.msra.mxu0 %v1902_v41 }
 0x233   :  { %v239_v5 = vsel %vm233_vm7, %v237_v4, %v238_v3  ;;  %729 = vmatpush.msra.mxu3 %v1906_v42  ;;  %749 = vmatpush.msra.mxu0 %v1908_v43 }
 0x234   :  { %388 = vrot.lane.b32.xlu1 %v239_v5, %s1787_s27 }
 0x235   :  { %730 = vmatpush.msra.mxu3 %v1910_v44  ;;  %750 = vmatpush.msra.mxu0 %v1912_v45 }
 0x237   :  { %731 = vmatpush.msra.mxu3 %v1918_v46  ;;  %751 = vmatpush.msra.mxu0 %v1920_v47 }
 0x239   :  { %732 = vmatpush.msra.mxu3 %v1930_v48  ;;  %752 = vmatpush.msra.mxu0 %v1932_v49 }
 0x23b   :  { %733 = vmatpush.msra.mxu3 %v1938_v50  ;;  %753 = vmatpush.msra.mxu0 %v1940_v51 }
 0x2a6   :  { %v389_v33 = vpop.permute.xlu1 %388 }
 0x2a9   :  { %v345_v10 = vpop.f32.mrf.mxu0 }
 0x2aa   :  { %v346_v11 = vadd.f32 %v345_v10, %v2014_v9 }
 0x2ac   :  { %1464 = vtanh.f32 %v346_v11  ;;  %v1402_v54 = vmul.f32 -1.442695, %v346_v11 }
 0x2af   :  { %v325_v15 = vpop.f32.mrf.mxu3 }
 0x2b0   :  { %v326_v17 = vadd.f32 %v325_v15, %v2018_v16 }
 0x2b2   :  { %v1465_v12 = vpop.eup %1464  ;;  %v1401_v18 = vmul.f32 -1.442695, %v326_v17 }
 0x2b3   :  { %393 = vrot.lane.b32.xlu2 %v1465_v12, %s1787_s27 }
 0x2b4   :  { %1466 = vpow2.f32 %v1401_v18 }
 0x2ba   :  { %v1467_v19 = vpop.eup %1466 }
 0x2bb   :  { %v351_v20 = vadd.f32 1.0, %v1467_v19 }
 0x2bd   :  { %1468 = vrcp.f32 %v351_v20  ;;  %v363_v26 = vand.u32 2147483648, %v351_v20  ;;  %vm357_vm10 = vweird.f32 %v351_v20  ;;  %v361_v27 = vand.u32 2147483647, %v351_v20 }
 0x2bf   :  { %v364_v29 = vor.u32 1.1754944e-38, %v363_v26  ;;  %vm362_vm12 = vcmp.eq.f32.partialorder %v361_v27, 8.507059e+37 }
 0x2c3   :  { %v1469_v21 = vpop.eup %1468 }
 0x2c4   :  { %v353_v22 = vmul.f32 %v1469_v21, %v351_v20  ;;  %vm358_vm9 = vweird.f32 %v1469_v21 }
 0x2c5   :  { %vm359_vm11 = vmor %vm357_vm10, %vm358_vm9 }
 0x2c6   :  { %v354_v23 = vsub.f32 1.0, %v353_v22 }
 0x2c8   :  { %v355_v24 = vmul.f32 %v1469_v21, %v354_v23 }
 0x2ca   :  { %v356_v25 = vadd.f32 %v1469_v21, %v355_v24 }
 0x2cc   :  { %v360_v28 = vsel %vm359_vm11, %v1469_v21, %v356_v25 }
 0x2cd   :  { %v365_v31 = vsel %vm362_vm12, %v364_v29, %v360_v28 }
 0x2ce   :  { %v391_v34 = vmul.f32 %v389_v33, %v365_v31 }
 0x30d   :  { %v394_v30 = vpop.permute.xlu2 %393 }
 0x30e   :  { %v396_v32 = vmul.f32 %v394_v30, %v365_v31 }
 0x310   :  { %398 = vrot.lane.b32.xlu2 %v396_v32, %s1787_s27 }
 0x36a   :  { %v399_v35 = vpop.permute.xlu2 %398 }
 0x36b   :  { %v401_v52 = vadd.f32 %v399_v35, %v391_v34 }
 0x36d   :  { %1470 = vtanh.f32 %v401_v52  ;;  %410 = vrot.lane.b32.xlu2 %v401_v52, %s1787_s27 }
 0x36e   :  { %1472 = vpow2.f32 %v1402_v54 }
 0x373   :  { %v1471_v53 = vpop.eup %1470 }
 0x374   :  { %404 = vrot.lane.b32.xlu1 %v1471_v53, %s1787_s27  ;;  %v1473_v55 = vpop.eup %1472 }
 0x375   :  { %v370_v56 = vadd.f32 1.0, %v1473_v55 }
 0x377   :  { %1474 = vrcp.f32 %v370_v56  ;;  %v382_v1 = vand.u32 2147483648, %v370_v56  ;;  %vm376_vm14 = vweird.f32 %v370_v56  ;;  %v380_v2 = vand.u32 2147483647, %v370_v56 }
 0x379   :  { %v383_v4 = vor.u32 1.1754944e-38, %v382_v1  ;;  %vm381_vm0 = vcmp.eq.f32.partialorder %v380_v2, 8.507059e+37 }
 0x37d   :  { %v1475_v59 = vpop.eup %1474 }
 0x37e   :  { %v372_v60 = vmul.f32 %v1475_v59, %v370_v56  ;;  %vm377_vm13 = vweird.f32 %v1475_v59 }
 0x37f   :  { %vm378_vm15 = vmor %vm376_vm14, %vm377_vm13 }
 0x380   :  { %v373_v61 = vsub.f32 1.0, %v372_v60 }
 0x382   :  { %v374_v63 = vmul.f32 %v1475_v59, %v373_v61 }
 0x384   :  { %v375_v0 = vadd.f32 %v1475_v59, %v374_v63 }
 0x386   :  { %v379_v3 = vsel %vm378_vm15, %v1475_v59, %v375_v0 }
 0x387   :  { %v384_v6 = vsel %vm381_vm0, %v383_v4, %v379_v3 }
 0x3c7   :  { %v411_v57 = vpop.permute.xlu2 %410 }
 0x3c8   :  { %v413_v58 = vsel %vm210_vm6, %v411_v57, %v239_v5 }
 0x3c9   :  { %497 = vrot.lane.b32.xlu1 %v413_v58, %s1787_s27 }
 0x3e6   :  { %v405_v7 = vpop.permute.xlu1 %404 }
 0x3e7   :  { %v407_v8 = vmul.f32 %v405_v7, %v384_v6 }
 0x3e9   :  { %v408_v5 = vsel %vm210_vm6, %v407_v8, %v1985_v62 }
 0x3ea   :  { %1403 = vmatmul.msk.f32.vlgmr.msra.gmra.mxu1 %vm304_vm8, %v408_v5  ;;  %1404 = vmatmul.msk.f32.vlgmr.msrb.gmra.mxu2 %vm304_vm8, %v408_v5 }
 0x3eb   :  { %825 = vmatpush.msra.mxu1 %v1884_v36  ;;  %845 = vmatpush.msrb.mxu2 %v1886_v37 }
 0x3ed   :  { %826 = vmatpush.msra.mxu1 %v1892_v38  ;;  %846 = vmatpush.msrb.mxu2 %v1894_v39 }
 0x3ef   :  { %827 = vmatpush.msra.mxu1 %v1900_v40  ;;  %847 = vmatpush.msrb.mxu2 %v1902_v41 }
 0x3f1   :  { %828 = vmatpush.msra.mxu1 %v1906_v42  ;;  %848 = vmatpush.msrb.mxu2 %v1908_v43 }
 0x3f3   :  { %829 = vmatpush.msra.mxu1 %v1910_v44  ;;  %849 = vmatpush.msrb.mxu2 %v1912_v45 }
 0x3f5   :  { %830 = vmatpush.msra.mxu1 %v1918_v46  ;;  %850 = vmatpush.msrb.mxu2 %v1920_v47 }
 0x3f7   :  { %831 = vmatpush.msra.mxu1 %v1930_v48  ;;  %851 = vmatpush.msrb.mxu2 %v1932_v49 }
 0x3f9   :  { %832 = vmatpush.msra.mxu1 %v1938_v50  ;;  %852 = vmatpush.msrb.mxu2 %v1940_v51 }
 0x43b   :  { %v498_v30 = vpop.permute.xlu1 %497 }
 0x467   :  { %v434_v12 = vpop.f32.mrf.mxu1 }
 0x468   :  { %v435_v13 = vadd.f32 %v434_v12, %v2018_v16 }
 0x46a   :  { %v1405_v14 = vmul.f32 -1.442695, %v435_v13 }
 0x46d   :  { %v454_v62 = vpop.f32.mrf.mxu2 }
 0x46e   :  { %v455_v10 = vadd.f32 %v454_v62, %v2014_v9 }
 0x470   :  { %1476 = vtanh.f32 %v455_v10  ;;  %v1406_v35 = vmul.f32 -1.442695, %v455_v10 }
 0x471   :  { %1478 = vpow2.f32 %v1405_v14 }
 0x476   :  { %v1477_v11 = vpop.eup %1476 }
 0x477   :  { %502 = vrot.lane.b32.xlu0 %v1477_v11, %s1787_s27  ;;  %v1479_v15 = vpop.eup %1478 }
 0x478   :  { %v463_v17 = vadd.f32 1.0, %v1479_v15 }
 0x47a   :  { %1480 = vrcp.f32 %v463_v17  ;;  %v476_v23 = vand.u32 2147483648, %v463_v17  ;;  %vm470_vm2 = vweird.f32 %v463_v17  ;;  %v474_v24 = vand.u32 2147483647, %v463_v17 }
 0x47c   :  { %v477_v26 = vor.u32 1.1754944e-38, %v476_v23  ;;  %vm475_vm4 = vcmp.eq.f32.partialorder %v474_v24, 8.507059e+37 }
 0x480   :  { %v1481_v18 = vpop.eup %1480 }
 0x481   :  { %v466_v19 = vmul.f32 %v1481_v18, %v463_v17  ;;  %vm471_vm1 = vweird.f32 %v1481_v18 }
 0x482   :  { %vm472_vm3 = vmor %vm470_vm2, %vm471_vm1 }
 0x483   :  { %v467_v20 = vsub.f32 1.0, %v466_v19 }
 0x485   :  { %v468_v21 = vmul.f32 %v1481_v18, %v467_v20 }
 0x487   :  { %v469_v22 = vadd.f32 %v1481_v18, %v468_v21 }
 0x489   :  { %v473_v25 = vsel %vm472_vm3, %v1481_v18, %v469_v22 }
 0x48a   :  { %v478_v28 = vsel %vm475_vm4, %v477_v26, %v473_v25 }
 0x48b   :  { %v500_v31 = vmul.f32 %v498_v30, %v478_v28 }
 0x4e9   :  { %v503_v27 = vpop.permute.xlu0 %502 }
 0x4ea   :  { %v505_v29 = vmul.f32 %v503_v27, %v478_v28 }
 0x4ec   :  { %507 = vrot.lane.b32.xlu2 %v505_v29, %s1787_s27 }
 0x546   :  { %v508_v32 = vpop.permute.xlu2 %507 }
 0x547   :  { %v2050_v33 = vadd.f32 %v508_v32, %v500_v31 }
 0x549   :  { %1482 = vtanh.f32 %v2050_v33 }
 0x54a   :  { %1484 = vpow2.f32 %v1406_v35 }
 0x54f   :  { %v1483_v34 = vpop.eup %1482 }
 0x550   :  { %513 = vrot.lane.b32.xlu0 %v1483_v34, %s1787_s27  ;;  %v1485_v52 = vpop.eup %1484 }
 0x551   :  { %v464_v53 = vadd.f32 1.0, %v1485_v52 }
 0x553   :  { %1486 = vrcp.f32 %v464_v53  ;;  %v491_v59 = vand.u32 2147483648, %v464_v53  ;;  %vm485_vm6 = vweird.f32 %v464_v53  ;;  %v489_v60 = vand.u32 2147483647, %v464_v53 }
 0x555   :  { %v492_v63 = vor.u32 1.1754944e-38, %v491_v59  ;;  %vm490_vm9 = vcmp.eq.f32.partialorder %v489_v60, 8.507059e+37 }
 0x559   :  { %v1487_v54 = vpop.eup %1486 }
 0x55a   :  { %v481_v55 = vmul.f32 %v1487_v54, %v464_v53  ;;  %vm486_vm5 = vweird.f32 %v1487_v54 }
 0x55b   :  { %vm487_vm7 = vmor %vm485_vm6, %vm486_vm5 }
 0x55c   :  { %v482_v56 = vsub.f32 1.0, %v481_v55 }
 0x55e   :  { %v483_v57 = vmul.f32 %v1487_v54, %v482_v56 }
 0x560   :  { %v484_v58 = vadd.f32 %v1487_v54, %v483_v57 }
 0x562   :  { %v488_v61 = vsel %vm487_vm7, %v1487_v54, %v484_v58 }
 0x563   :  { %v493_v0 = vsel %vm490_vm9, %v492_v63, %v488_v61 }
 0x5c2   :  { %v514_v1 = vpop.permute.xlu0 %513 }
 0x5c3   :  { %v2054_v2 = vmul.f32 %v514_v1, %v493_v0 }
 0x5c5   :  { %1407 = vmatmul.msk.f32.vlgmr.msrb.gmra.mxu3 %vm304_vm8, %v2054_v2  ;;  %1408 = vmatmul.msk.f32.vlgmr.msrb.gmra.mxu0 %vm304_vm8, %v2054_v2 }
 0x5c6   :  { %924 = vmatpush.msrb.mxu3 %v1884_v36  ;;  %944 = vmatpush.msrb.mxu0 %v1886_v37 }
 0x5c8   :  { %925 = vmatpush.msrb.mxu3 %v1892_v38  ;;  %945 = vmatpush.msrb.mxu0 %v1894_v39 }
 0x5ca   :  { %926 = vmatpush.msrb.mxu3 %v1900_v40  ;;  %946 = vmatpush.msrb.mxu0 %v1902_v41 }
 0x5cc   :  { %927 = vmatpush.msrb.mxu3 %v1906_v42  ;;  %947 = vmatpush.msrb.mxu0 %v1908_v43 }
 0x5ce   :  { %928 = vmatpush.msrb.mxu3 %v1910_v44  ;;  %948 = vmatpush.msrb.mxu0 %v1912_v45 }
 0x5d0   :  { %929 = vmatpush.msrb.mxu3 %v1918_v46  ;;  %949 = vmatpush.msrb.mxu0 %v1920_v47 }
 0x5d2   :  { %930 = vmatpush.msrb.mxu3 %v1930_v48  ;;  %950 = vmatpush.msrb.mxu0 %v1932_v49 }
 0x5d4   :  { %931 = vmatpush.msrb.mxu3 %v1938_v50  ;;  %951 = vmatpush.msrb.mxu0 %v1940_v51 }
 0x642   :  { %v557_v3 = vpop.f32.mrf.mxu0 }
 0x643   :  { %v558_v4 = vadd.f32 %v557_v3, %v2014_v9 }
 0x645   :  { %1488 = vtanh.f32 %v558_v4  ;;  %v1410_v28 = vmul.f32 -1.442695, %v558_v4 }
 0x648   :  { %v537_v7 = vpop.f32.mrf.mxu3 }
 0x649   :  { %v538_v8 = vadd.f32 %v537_v7, %v2018_v16 }
 0x64b   :  { %v1489_v6 = vpop.eup %1488  ;;  %v1409_v5 = vmul.f32 -1.442695, %v538_v8 }
 0x64c   :  { %601 = vrot.lane.b32.xlu1 %v1489_v6, %s1787_s27 }
 0x64d   :  { %1490 = vpow2.f32 %v1409_v5 }
 0x653   :  { %v1491_v62 = vpop.eup %1490 }
 0x654   :  { %v566_v10 = vadd.f32 1.0, %v1491_v62 }
 0x656   :  { %1492 = vrcp.f32 %v566_v10  ;;  %v579_v17 = vand.u32 2147483648, %v566_v10  ;;  %vm573_vm11 = vweird.f32 %v566_v10  ;;  %v577_v18 = vand.u32 2147483647, %v566_v10 }
 0x658   :  { %v580_v20 = vor.u32 1.1754944e-38, %v579_v17  ;;  %vm578_vm13 = vcmp.eq.f32.partialorder %v577_v18, 8.507059e+37 }
 0x65c   :  { %v1493_v11 = vpop.eup %1492 }
 0x65d   :  { %v569_v12 = vmul.f32 %v1493_v11, %v566_v10  ;;  %vm574_vm10 = vweird.f32 %v1493_v11 }
 0x65e   :  { %vm575_vm12 = vmor %vm573_vm11, %vm574_vm10 }
 0x65f   :  { %v570_v13 = vsub.f32 1.0, %v569_v12 }
 0x661   :  { %v571_v14 = vmul.f32 %v1493_v11, %v570_v13 }
 0x663   :  { %v572_v15 = vadd.f32 %v1493_v11, %v571_v14 }
 0x665   :  { %v576_v19 = vsel %vm575_vm12, %v1493_v11, %v572_v15 }
 0x666   :  { %v581_v22 = vsel %vm578_vm13, %v580_v20, %v576_v19 }
 0x667   :  { %v599_v24 = vmul.f32 %v581_v22, %v2050_v33 }
 0x6be   :  { %v602_v21 = vpop.permute.xlu1 %601 }
 0x6bf   :  { %v604_v23 = vmul.f32 %v602_v21, %v581_v22 }
 0x6c1   :  { %606 = vrot.lane.b32.xlu2 %v604_v23, %s1787_s27 }
 0x71b   :  { %v607_v25 = vpop.permute.xlu2 %606 }
 0x71c   :  { %v2081_v26 = vadd.f32 %v607_v25, %v599_v24 }
 0x71e   :  { %1494 = vtanh.f32 %v2081_v26 }
 0x71f   :  { %1496 = vpow2.f32 %v1410_v28 }
 0x724   :  { %v1495_v27 = vpop.eup %1494 }
 0x725   :  { %612 = vrot.lane.b32.xlu0 %v1495_v27, %s1787_s27  ;;  %v1497_v29 = vpop.eup %1496 }
 0x726   :  { %v567_v30 = vadd.f32 1.0, %v1497_v29 }
 0x728   :  { %1498 = vrcp.f32 %v567_v30  ;;  %v594_v33 = vand.u32 2147483648, %v567_v30  ;;  %vm588_vm15 = vweird.f32 %v567_v30  ;;  %v592_v53 = vand.u32 2147483647, %v567_v30 }
 0x72a   :  { %v595_v55 = vor.u32 1.1754944e-38, %v594_v33  ;;  %vm593_vm1 = vcmp.eq.f32.partialorder %v592_v53, 8.507059e+37 }
 0x72e   :  { %v1499_v31 = vpop.eup %1498 }
 0x72f   :  { %v584_v32 = vmul.f32 %v1499_v31, %v567_v30  ;;  %vm589_vm14 = vweird.f32 %v1499_v31 }
 0x730   :  { %vm590_vm0 = vmor %vm588_vm15, %vm589_vm14 }
 0x731   :  { %v585_v34 = vsub.f32 1.0, %v584_v32 }
 0x733   :  { %v586_v35 = vmul.f32 %v1499_v31, %v585_v34 }
 0x735   :  { %v587_v52 = vadd.f32 %v1499_v31, %v586_v35 }
 0x737   :  { %v591_v54 = vsel %vm590_vm0, %v1499_v31, %v587_v52 }
 0x738   :  { %v596_v56 = vsel %vm593_vm1, %v595_v55, %v591_v54 }
 0x797   :  { %v613_v57 = vpop.permute.xlu0 %612 }
 0x798   :  { %v2085_v58 = vmul.f32 %v613_v57, %v596_v56 }
 0x79a   :  { %1411 = vmatmul.msk.f32.vlgmr.msrb.gmra.mxu1 %vm304_vm8, %v2085_v58  ;;  %1412 = vmatmul.msk.f32.vlgmr.msra.gmra.mxu2 %vm304_vm8, %v2085_v58 }
 0x79b   :  { %1023 = vmatpush.msrb.mxu1 %v1884_v36  ;;  %1043 = vmatpush.msra.mxu2 %v1886_v37 }
 0x79d   :  { %1024 = vmatpush.msrb.mxu1 %v1892_v38  ;;  %1044 = vmatpush.msra.mxu2 %v1894_v39 }
 0x79f   :  { %1025 = vmatpush.msrb.mxu1 %v1900_v40  ;;  %1045 = vmatpush.msra.mxu2 %v1902_v41 }
 0x7a1   :  { %1026 = vmatpush.msrb.mxu1 %v1906_v42  ;;  %1046 = vmatpush.msra.mxu2 %v1908_v43 }
 0x7a3   :  { %1027 = vmatpush.msrb.mxu1 %v1910_v44  ;;  %1047 = vmatpush.msra.mxu2 %v1912_v45 }
 0x7a5   :  { %1028 = vmatpush.msrb.mxu1 %v1918_v46  ;;  %1048 = vmatpush.msra.mxu2 %v1920_v47 }
 0x7a7   :  { %1029 = vmatpush.msrb.mxu1 %v1930_v48  ;;  %1049 = vmatpush.msra.mxu2 %v1932_v49 }
 0x7a9   :  { %1030 = vmatpush.msrb.mxu1 %v1938_v50  ;;  %1050 = vmatpush.msra.mxu2 %v1940_v51 }
 0x817   :  { %v636_v63 = vpop.f32.mrf.mxu1 }
 0x818   :  { %v637_v0 = vadd.f32 %v636_v63, %v2018_v16 }
 0x81a   :  { %v1413_v1 = vmul.f32 -1.442695, %v637_v0 }
 0x81d   :  { %v656_v59 = vpop.f32.mrf.mxu2 }
 0x81e   :  { %v657_v60 = vadd.f32 %v656_v59, %v2014_v9 }
 0x820   :  { %1500 = vtanh.f32 %v657_v60  ;;  %v1414_v22 = vmul.f32 -1.442695, %v657_v60 }
 0x821   :  { %1502 = vpow2.f32 %v1413_v1 }
 0x826   :  { %v1501_v61 = vpop.eup %1500 }
 0x827   :  { %700 = vrot.lane.b32.xlu1 %v1501_v61, %s1787_s27  ;;  %v1503_v3 = vpop.eup %1502 }
 0x828   :  { %v665_v4 = vadd.f32 1.0, %v1503_v3 }
 0x82a   :  { %1504 = vrcp.f32 %v665_v4  ;;  %v678_v10 = vand.u32 2147483648, %v665_v4  ;;  %vm672_vm3 = vweird.f32 %v665_v4  ;;  %v676_v11 = vand.u32 2147483647, %v665_v4 }
 0x82c   :  { %v679_v13 = vor.u32 1.1754944e-38, %v678_v10  ;;  %vm677_vm5 = vcmp.eq.f32.partialorder %v676_v11, 8.507059e+37 }
 0x830   :  { %v1505_v6 = vpop.eup %1504 }
 0x831   :  { %v668_v7 = vmul.f32 %v1505_v6, %v665_v4  ;;  %vm673_vm2 = vweird.f32 %v1505_v6 }
 0x832   :  { %vm674_vm4 = vmor %vm672_vm3, %vm673_vm2 }
 0x833   :  { %v669_v8 = vsub.f32 1.0, %v668_v7 }
 0x835   :  { %v670_v5 = vmul.f32 %v1505_v6, %v669_v8 }
 0x837   :  { %v671_v62 = vadd.f32 %v1505_v6, %v670_v5 }
 0x839   :  { %v675_v12 = vsel %vm674_vm4, %v1505_v6, %v671_v62 }
 0x83a   :  { %v680_v15 = vsel %vm677_vm5, %v679_v13, %v675_v12 }
 0x83b   :  { %v698_v18 = vmul.f32 %v680_v15, %v2081_v26 }
 0x899   :  { %v701_v14 = vpop.permute.xlu1 %700 }
 0x89a   :  { %v703_v17 = vmul.f32 %v701_v14, %v680_v15 }
 0x89c   :  { %705 = vrot.lane.b32.xlu2 %v703_v17, %s1787_s27 }
 0x8f6   :  { %v706_v19 = vpop.permute.xlu2 %705 }
 0x8f7   :  { %v2112_v20 = vadd.f32 %v706_v19, %v698_v18 }
 0x8f9   :  { %1506 = vtanh.f32 %v2112_v20 }
 0x8fa   :  { %1508 = vpow2.f32 %v1414_v22 }
 0x8ff   :  { %v1507_v21 = vpop.eup %1506 }
 0x900   :  { %711 = vrot.lane.b32.xlu0 %v1507_v21, %s1787_s27  ;;  %v1509_v23 = vpop.eup %1508 }
 0x901   :  { %v666_v24 = vadd.f32 1.0, %v1509_v23 }
 0x903   :  { %1510 = vrcp.f32 %v666_v24  ;;  %v693_v26 = vand.u32 2147483648, %v666_v24  ;;  %vm687_vm7 = vweird.f32 %v666_v24  ;;  %v691_v31 = vand.u32 2147483647, %v666_v24 }
 0x905   :  { %v694_v34 = vor.u32 1.1754944e-38, %v693_v26  ;;  %vm692_vm10 = vcmp.eq.f32.partialorder %v691_v31, 8.507059e+37 }
 0x909   :  { %v1511_v25 = vpop.eup %1510 }
 0x90a   :  { %v683_v27 = vmul.f32 %v1511_v25, %v666_v24  ;;  %vm688_vm6 = vweird.f32 %v1511_v25 }
 0x90b   :  { %vm689_vm9 = vmor %vm687_vm7, %vm688_vm6 }
 0x90c   :  { %v684_v28 = vsub.f32 1.0, %v683_v27 }
 0x90e   :  { %v685_v29 = vmul.f32 %v1511_v25, %v684_v28 }
 0x910   :  { %v686_v30 = vadd.f32 %v1511_v25, %v685_v29 }
 0x912   :  { %v690_v32 = vsel %vm689_vm9, %v1511_v25, %v686_v30 }
 0x913   :  { %v695_v35 = vsel %vm692_vm10, %v694_v34, %v690_v32 }
 0x972   :  { %v712_v52 = vpop.permute.xlu0 %711 }
 0x973   :  { %v2116_v33 = vmul.f32 %v712_v52, %v695_v35 }
 0x975   :  { %1415 = vmatmul.msk.f32.vlgmr.msra.gmra.mxu3 %vm304_vm8, %v2116_v33  ;;  %1416 = vmatmul.msk.f32.vlgmr.msra.gmra.mxu0 %vm304_vm8, %v2116_v33 }
 0x976   :  { %1122 = vmatpush.msra.mxu3 %v1884_v36  ;;  %1142 = vmatpush.msra.mxu0 %v1886_v37 }
 0x978   :  { %1123 = vmatpush.msra.mxu3 %v1892_v38  ;;  %1143 = vmatpush.msra.mxu0 %v1894_v39 }
 0x97a   :  { %1124 = vmatpush.msra.mxu3 %v1900_v40  ;;  %1144 = vmatpush.msra.mxu0 %v1902_v41 }
 0x97c   :  { %1125 = vmatpush.msra.mxu3 %v1906_v42  ;;  %1145 = vmatpush.msra.mxu0 %v1908_v43 }
 0x97e   :  { %1126 = vmatpush.msra.mxu3 %v1910_v44  ;;  %1146 = vmatpush.msra.mxu0 %v1912_v45 }
 0x980   :  { %1127 = vmatpush.msra.mxu3 %v1918_v46  ;;  %1147 = vmatpush.msra.mxu0 %v1920_v47 }
 0x982   :  { %1128 = vmatpush.msra.mxu3 %v1930_v48  ;;  %1148 = vmatpush.msra.mxu0 %v1932_v49 }
 0x984   :  { %1129 = vmatpush.msra.mxu3 %v1938_v50  ;;  %1149 = vmatpush.msra.mxu0 %v1940_v51 }
 0x9f2   :  { %v755_v36 = vpop.f32.mrf.mxu0 }
 0x9f3   :  { %v756_v37 = vadd.f32 %v755_v36, %v2014_v9 }
 0x9f5   :  { %1512 = vtanh.f32 %v756_v37  ;;  %v1418_v63 = vmul.f32 -1.442695, %v756_v37 }
 0x9f8   :  { %v735_v39 = vpop.f32.mrf.mxu3 }
 0x9f9   :  { %v736_v40 = vadd.f32 %v735_v39, %v2018_v16 }
 0x9fb   :  { %v1513_v38 = vpop.eup %1512  ;;  %v1417_v41 = vmul.f32 -1.442695, %v736_v40 }
 0x9fc   :  { %799 = vrot.lane.b32.xlu1 %v1513_v38, %s1787_s27 }
 0x9fd   :  { %1514 = vpow2.f32 %v1417_v41 }
 0xa03   :  { %v1515_v42 = vpop.eup %1514 }
 0xa04   :  { %v764_v43 = vadd.f32 1.0, %v1515_v42 }
 0xa06   :  { %1516 = vrcp.f32 %v764_v43  ;;  %v777_v49 = vand.u32 2147483648, %v764_v43  ;;  %vm771_vm12 = vweird.f32 %v764_v43  ;;  %v775_v50 = vand.u32 2147483647, %v764_v43 }
 0xa08   :  { %v778_v53 = vor.u32 1.1754944e-38, %v777_v49  ;;  %vm776_vm14 = vcmp.eq.f32.partialorder %v775_v50, 8.507059e+37 }
 0xa0c   :  { %v1517_v44 = vpop.eup %1516 }
 0xa0d   :  { %v767_v45 = vmul.f32 %v1517_v44, %v764_v43  ;;  %vm772_vm11 = vweird.f32 %v1517_v44 }
 0xa0e   :  { %vm773_vm13 = vmor %vm771_vm12, %vm772_vm11 }
 0xa0f   :  { %v768_v46 = vsub.f32 1.0, %v767_v45 }
 0xa11   :  { %v769_v47 = vmul.f32 %v1517_v44, %v768_v46 }
 0xa13   :  { %v770_v48 = vadd.f32 %v1517_v44, %v769_v47 }
 0xa15   :  { %v774_v51 = vsel %vm773_vm13, %v1517_v44, %v770_v48 }
 0xa16   :  { %v779_v55 = vsel %vm776_vm14, %v778_v53, %v774_v51 }
 0xa17   :  { %v797_v57 = vmul.f32 %v779_v55, %v2112_v20 }
 0xa6e   :  { %v800_v54 = vpop.permute.xlu1 %799 }
 0xa6f   :  { %v802_v56 = vmul.f32 %v800_v54, %v779_v55 }
 0xa71   :  { %804 = vrot.lane.b32.xlu2 %v802_v56, %s1787_s27 }
 0xacb   :  { %v805_v59 = vpop.permute.xlu2 %804 }
 0xacc   :  { %v807_v60 = vadd.f32 %v805_v59, %v797_v57 }
 0xace   :  { %1518 = vtanh.f32 %v807_v60 }
 0xacf   :  { %1520 = vpow2.f32 %v1418_v63 }
 0xad4   :  { %v1519_v61 = vpop.eup %1518 }
 0xad5   :  { %810 = vrot.lane.b32.xlu0 %v1519_v61, %s1787_s27  ;;  %v1521_v0 = vpop.eup %1520 }
 0xad6   :  { %v765_v1 = vadd.f32 1.0, %v1521_v0 }
 0xad8   :  { %1522 = vrcp.f32 %v765_v1  ;;  %v792_v5 = vand.u32 2147483648, %v765_v1  ;;  %vm786_vm0 = vweird.f32 %v765_v1  ;;  %v790_v62 = vand.u32 2147483647, %v765_v1 }
 0xada   :  { %v793_v11 = vor.u32 1.1754944e-38, %v792_v5  ;;  %vm791_vm2 = vcmp.eq.f32.partialorder %v790_v62, 8.507059e+37 }
 0xade   :  { %v1523_v3 = vpop.eup %1522 }
 0xadf   :  { %v782_v4 = vmul.f32 %v1523_v3, %v765_v1  ;;  %vm787_vm15 = vweird.f32 %v1523_v3 }
 0xae0   :  { %vm788_vm1 = vmor %vm786_vm0, %vm787_vm15 }
 0xae1   :  { %v783_v6 = vsub.f32 1.0, %v782_v4 }
 0xae3   :  { %v784_v7 = vmul.f32 %v1523_v3, %v783_v6 }
 0xae5   :  { %v785_v8 = vadd.f32 %v1523_v3, %v784_v7 }
 0xae7   :  { %v789_v10 = vsel %vm788_vm1, %v1523_v3, %v785_v8 }
 0xae8   :  { %v794_v12 = vsel %vm791_vm2, %v793_v11, %v789_v10 }
 0xb47   :  { %v811_v13 = vpop.permute.xlu0 %810 }
 0xb48   :  { %v2144_v14 = vmul.f32 %v811_v13, %v794_v12 }
 0xb4a   :  { %1419 = vmatmul.msk.f32.vlgmr.msra.gmra.mxu1 %vm304_vm8, %v2144_v14  ;;  %1420 = vmatmul.msk.f32.vlgmr.msrb.gmra.mxu2 %vm304_vm8, %v2144_v14 }
 0xbc7   :  { %v834_v19 = vpop.f32.mrf.mxu1 }
 0xbc8   :  { %v835_v20 = vadd.f32 %v834_v19, %v2018_v16 }
 0xbca   :  { %v1421_v21 = vmul.f32 -1.442695, %v835_v20 }
 0xbcd   :  { %v854_v15 = vpop.f32.mrf.mxu2 }
 0xbce   :  { %v855_v17 = vadd.f32 %v854_v15, %v2014_v9 }
 0xbd0   :  { %1524 = vtanh.f32 %v855_v17  ;;  %v1422_v40 = vmul.f32 -1.442695, %v855_v17 }
 0xbd1   :  { %1526 = vpow2.f32 %v1421_v21 }
 0xbd6   :  { %v1525_v18 = vpop.eup %1524 }
 0xbd7   :  { %898 = vrot.lane.b32.xlu1 %v1525_v18, %s1787_s27  ;;  %v1527_v22 = vpop.eup %1526 }
 0xbd8   :  { %v863_v23 = vadd.f32 1.0, %v1527_v22 }
 0xbda   :  { %1528 = vrcp.f32 %v863_v23  ;;  %v876_v30 = vand.u32 2147483648, %v863_v23  ;;  %vm870_vm4 = vweird.f32 %v863_v23  ;;  %v874_v26 = vand.u32 2147483647, %v863_v23 }
 0xbdc   :  { %v877_v32 = vor.u32 1.1754944e-38, %v876_v30  ;;  %vm875_vm6 = vcmp.eq.f32.partialorder %v874_v26, 8.507059e+37 }
 0xbe0   :  { %v1529_v24 = vpop.eup %1528 }
 0xbe1   :  { %v866_v25 = vmul.f32 %v1529_v24, %v863_v23  ;;  %vm871_vm3 = vweird.f32 %v1529_v24 }
 0xbe2   :  { %vm872_vm5 = vmor %vm870_vm4, %vm871_vm3 }
 0xbe3   :  { %v867_v27 = vsub.f32 1.0, %v866_v25 }
 0xbe5   :  { %v868_v28 = vmul.f32 %v1529_v24, %v867_v27 }
 0xbe7   :  { %v869_v29 = vadd.f32 %v1529_v24, %v868_v28 }
 0xbe9   :  { %v873_v31 = vsel %vm872_vm5, %v1529_v24, %v869_v29 }
 0xbea   :  { %v878_v35 = vsel %vm875_vm6, %v877_v32, %v873_v31 }
 0xbeb   :  { %v896_v36 = vmul.f32 %v878_v35, %v807_v60 }
 0xc49   :  { %v899_v34 = vpop.permute.xlu1 %898 }
 0xc4a   :  { %v901_v52 = vmul.f32 %v899_v34, %v878_v35 }
 0xc4c   :  { %903 = vrot.lane.b32.xlu2 %v901_v52, %s1787_s27 }
 0xca6   :  { %v904_v37 = vpop.permute.xlu2 %903 }
 0xca7   :  { %v906_v38 = vadd.f32 %v904_v37, %v896_v36 }
 0xca9   :  { %1530 = vtanh.f32 %v906_v38 }
 0xcaa   :  { %1532 = vpow2.f32 %v1422_v40 }
 0xcaf   :  { %v1531_v39 = vpop.eup %1530 }
 0xcb0   :  { %909 = vrot.lane.b32.xlu0 %v1531_v39, %s1787_s27  ;;  %v1533_v41 = vpop.eup %1532 }
 0xcb1   :  { %v864_v42 = vadd.f32 1.0, %v1533_v41 }
 0xcb3   :  { %1534 = vrcp.f32 %v864_v42  ;;  %v891_v48 = vand.u32 2147483648, %v864_v42  ;;  %vm885_vm9 = vweird.f32 %v864_v42  ;;  %v889_v49 = vand.u32 2147483647, %v864_v42 }
 0xcb5   :  { %v892_v51 = vor.u32 1.1754944e-38, %v891_v48  ;;  %vm890_vm11 = vcmp.eq.f32.partialorder %v889_v49, 8.507059e+37 }
 0xcb9   :  { %v1535_v43 = vpop.eup %1534 }
 0xcba   :  { %v881_v44 = vmul.f32 %v1535_v43, %v864_v42  ;;  %vm886_vm7 = vweird.f32 %v1535_v43 }
 0xcbb   :  { %vm887_vm10 = vmor %vm885_vm9, %vm886_vm7 }
 0xcbc   :  { %v882_v45 = vsub.f32 1.0, %v881_v44 }
 0xcbe   :  { %v883_v46 = vmul.f32 %v1535_v43, %v882_v45 }
 0xcc0   :  { %v884_v47 = vadd.f32 %v1535_v43, %v883_v46 }
 0xcc2   :  { %v888_v50 = vsel %vm887_vm10, %v1535_v43, %v884_v47 }
 0xcc3   :  { %v893_v53 = vsel %vm890_vm11, %v892_v51, %v888_v50 }
 0xd22   :  { %v910_v54 = vpop.permute.xlu0 %909 }
 0xd23   :  { %v2155_v55 = vmul.f32 %v910_v54, %v893_v53 }
 0xd25   :  { %1423 = vmatmul.msk.f32.vlgmr.msrb.gmra.mxu3 %vm304_vm8, %v2155_v55  ;;  %1424 = vmatmul.msk.f32.vlgmr.msrb.gmra.mxu0 %vm304_vm8, %v2155_v55 }
 0xda2   :  { %v953_v56 = vpop.f32.mrf.mxu0 }
 0xda3   :  { %v954_v57 = vadd.f32 %v953_v56, %v2014_v9 }
 0xda5   :  { %1536 = vtanh.f32 %v954_v57  ;;  %v1426_v21 = vmul.f32 -1.442695, %v954_v57 }
 0xda8   :  { %v933_v60 = vpop.f32.mrf.mxu3 }
 0xda9   :  { %v934_v61 = vadd.f32 %v933_v60, %v2018_v16 }
 0xdab   :  { %v1537_v59 = vpop.eup %1536  ;;  %v1425_v63 = vmul.f32 -1.442695, %v934_v61 }
 0xdac   :  { %997 = vrot.lane.b32.xlu1 %v1537_v59, %s1787_s27 }
 0xdad   :  { %1538 = vpow2.f32 %v1425_v63 }
 0xdb3   :  { %v1539_v0 = vpop.eup %1538 }
 0xdb4   :  { %v962_v1 = vadd.f32 1.0, %v1539_v0 }
 0xdb6   :  { %1540 = vrcp.f32 %v962_v1  ;;  %v975_v5 = vand.u32 2147483648, %v962_v1  ;;  %vm969_vm13 = vweird.f32 %v962_v1  ;;  %v973_v62 = vand.u32 2147483647, %v962_v1 }
 0xdb8   :  { %v976_v11 = vor.u32 1.1754944e-38, %v975_v5  ;;  %vm974_vm15 = vcmp.eq.f32.partialorder %v973_v62, 8.507059e+37 }
 0xdbc   :  { %v1541_v3 = vpop.eup %1540 }
 0xdbd   :  { %v965_v4 = vmul.f32 %v1541_v3, %v962_v1  ;;  %vm970_vm12 = vweird.f32 %v1541_v3 }
 0xdbe   :  { %vm971_vm14 = vmor %vm969_vm13, %vm970_vm12 }
 0xdbf   :  { %v966_v6 = vsub.f32 1.0, %v965_v4 }
 0xdc1   :  { %v967_v7 = vmul.f32 %v1541_v3, %v966_v6 }
 0xdc3   :  { %v968_v8 = vadd.f32 %v1541_v3, %v967_v7 }
 0xdc5   :  { %v972_v10 = vsel %vm971_vm14, %v1541_v3, %v968_v8 }
 0xdc6   :  { %v977_v13 = vsel %vm974_vm15, %v976_v11, %v972_v10 }
 0xdc7   :  { %v995_v17 = vmul.f32 %v977_v13, %v906_v38 }
 0xe1e   :  { %v998_v12 = vpop.permute.xlu1 %997 }
 0xe1f   :  { %v1000_v15 = vmul.f32 %v998_v12, %v977_v13 }
 0xe21   :  { %1002 = vrot.lane.b32.xlu2 %v1000_v15, %s1787_s27 }
 0xe7b   :  { %v1003_v18 = vpop.permute.xlu2 %1002 }
 0xe7c   :  { %v1005_v19 = vadd.f32 %v1003_v18, %v995_v17  ;;  %v1258_v18 = vld [vmem:[#allocation13 + $0xf8] sm:$0xff] }
 0xe7d   :  { %1315 = vmatpush.msrb.mxu2 %v1258_v18 }
 0xe7e   :  { %1542 = vtanh.f32 %v1005_v19 }
 0xe7f   :  { %1544 = vpow2.f32 %v1426_v21  ;;  %v1273_v21 = vld [vmem:[#allocation13 + $0x170] sm:$0xff] }
 0xe84   :  { %v1543_v20 = vpop.eup %1542 }
 0xe85   :  { %1008 = vrot.lane.b32.xlu0 %v1543_v20, %s1787_s27  ;;  %v1545_v22 = vpop.eup %1544  ;;  %v1257_v20 = vld [vmem:[#allocation13 + $0xf0] sm:$0xff] }
 0xe86   :  { %v963_v23 = vadd.f32 1.0, %v1545_v22  ;;  %v1256_v22 = vld [vmem:[#allocation13 + $0xe8] sm:$0xff]  ;;  %1316 = vmatpush.msrb.mxu2 %v1257_v20 }
 0xe87   :  { %v1232_v20 = vld [vmem:[#allocation13 + $0x28] sm:$0xff] }
 0xe88   :  { %1546 = vrcp.f32 %v963_v23  ;;  %v990_v30 = vand.u32 2147483648, %v963_v23  ;;  %vm984_vm1 = vweird.f32 %v963_v23  ;;  %v988_v26 = vand.u32 2147483647, %v963_v23  ;;  %1317 = vmatpush.msrb.mxu2 %v1256_v22 }
 0xe8a   :  { %v991_v32 = vor.u32 1.1754944e-38, %v990_v30  ;;  %vm989_vm3 = vcmp.eq.f32.partialorder %v988_v26, 8.507059e+37  ;;  %v1269_v30 = vld [vmem:[#allocation13 + $0x150] sm:$0xff]  ;;  %v1252_v26 = vld [vmem:[#allocation13 + $0xc8] sm:$0xff] }
 0xe8e   :  { %v1547_v24 = vpop.eup %1546 }
 0xe8f   :  { %v980_v25 = vmul.f32 %v1547_v24, %v963_v23  ;;  %vm985_vm0 = vweird.f32 %v1547_v24  ;;  %v1272_v23 = vld [vmem:[#allocation13 + $0x168] sm:$0xff] }
 0xe90   :  { %vm986_vm2 = vmor %vm984_vm1, %vm985_vm0 }
 0xe91   :  { %v981_v27 = vsub.f32 1.0, %v980_v25  ;;  %v1271_v25 = vld [vmem:[#allocation13 + $0x160] sm:$0xff] }
 0xe93   :  { %v982_v28 = vmul.f32 %v1547_v24, %v981_v27  ;;  %v1254_v27 = vld [vmem:[#allocation13 + $0xd8] sm:$0xff] }
 0xe95   :  { %v983_v29 = vadd.f32 %v1547_v24, %v982_v28  ;;  %v1270_v28 = vld [vmem:[#allocation13 + $0x158] sm:$0xff] }
 0xe97   :  { %v987_v31 = vsel %vm986_vm2, %v1547_v24, %v983_v29  ;;  %v1255_v24 = vld [vmem:[#allocation13 + $0xe0] sm:$0xff]  ;;  %v1253_v29 = vld [vmem:[#allocation13 + $0xd0] sm:$0xff] }
 0xe98   :  { %v992_v34 = vsel %vm989_vm3, %v991_v32, %v987_v31  ;;  %1318 = vmatpush.msrb.mxu2 %v1255_v24  ;;  %v1268_v31 = vld [vmem:[#allocation13 + $0x148] sm:$0xff] }
 0xe9a   :  { %1319 = vmatpush.msrb.mxu2 %v1254_v27 }
 0xe9c   :  { %1320 = vmatpush.msrb.mxu2 %v1253_v29 }
 0xe9e   :  { %1321 = vmatpush.msrb.mxu2 %v1252_v26  ;;  %v1230_v26 = vld [vmem:[#allocation13 + $0x18] sm:$0xff] }
 0xef7   :  { %v1009_v35 = vpop.permute.xlu0 %1008 }
 0xef8   :  { %v2166_v52 = vmul.f32 %v1009_v35, %v992_v34  ;;  %v1251_v34 = vld [vmem:[#allocation13 + $0xc0] sm:$0xff] }
 0xef9   :  { %v1267_v35 = vld [vmem:[#allocation13 + $0x140] sm:$0xff]  ;;  %1322 = vmatpush.msrb.mxu2 %v1251_v34 }
 0xefa   :  { %1427 = vmatmul.msk.f32.vlgmr.msrb.gmra.mxu1 %vm304_vm8, %v2166_v52  ;;  %1428 = vmatmul.msk.f32.vlgmr.msra.gmra.mxu2 %vm304_vm8, %v2166_v52  ;;  %v1227_v34 = vld [vmem:[#allocation13] sm:$0xff] }
 0xf77   :  { %v1032_v39 = vpop.f32.mrf.mxu1 }
 0xf78   :  { %v1033_v40 = vadd.f32 %v1032_v39, %v2018_v16  ;;  %v1249_v39 = vld [vmem:[#allocation13 + $0xb0] sm:$0xff] }
 0xf7a   :  { %v1429_v41 = vmul.f32 -1.442695, %v1033_v40  ;;  %v1265_v40 = vld [vmem:[#allocation13 + $0x130] sm:$0xff] }
 0xf7d   :  { %v1052_v36 = vpop.f32.mrf.mxu2 }
 0xf7e   :  { %v1053_v37 = vadd.f32 %v1052_v36, %v2014_v9 }
 0xf80   :  { %1548 = vtanh.f32 %v1053_v37  ;;  %v1430_v0 = vmul.f32 -1.442695, %v1053_v37  ;;  %v1250_v37 = vld [vmem:[#allocation13 + $0xb8] sm:$0xff] }
 0xf81   :  { %1550 = vpow2.f32 %v1429_v41  ;;  %1323 = vmatpush.msrb.mxu2 %v1250_v37 }
 0xf83   :  { %1324 = vmatpush.msrb.mxu2 %v1249_v39 }
 0xf86   :  { %v1549_v38 = vpop.eup %1548 }
 0xf87   :  { %1096 = vrot.lane.b32.xlu1 %v1549_v38, %s1787_s27  ;;  %v1551_v42 = vpop.eup %1550  ;;  %v1266_v38 = vld [vmem:[#allocation13 + $0x138] sm:$0xff] }
 0xf88   :  { %v1061_v43 = vadd.f32 1.0, %v1551_v42 }
 0xf8a   :  { %1552 = vrcp.f32 %v1061_v43  ;;  %v1074_v49 = vand.u32 2147483648, %v1061_v43  ;;  %vm1068_vm5 = vweird.f32 %v1061_v43  ;;  %v1072_v50 = vand.u32 2147483647, %v1061_v43 }
 0xf8c   :  { %v1075_v53 = vor.u32 1.1754944e-38, %v1074_v49  ;;  %vm1073_vm7 = vcmp.eq.f32.partialorder %v1072_v50, 8.507059e+37  ;;  %v1247_v49 = vld [vmem:[#allocation13 + $0xa0] sm:$0xff] }
 0xf8d   :  { %v1263_v50 = vld [vmem:[#allocation13 + $0x120] sm:$0xff] }
 0xf90   :  { %v1553_v44 = vpop.eup %1552 }
 0xf91   :  { %v1064_v45 = vmul.f32 %v1553_v44, %v1061_v43  ;;  %vm1069_vm4 = vweird.f32 %v1553_v44 }
 0xf92   :  { %vm1070_vm6 = vmor %vm1068_vm5, %vm1069_vm4 }
 0xf93   :  { %v1065_v46 = vsub.f32 1.0, %v1064_v45 }
 0xf95   :  { %v1066_v47 = vmul.f32 %v1553_v44, %v1065_v46 }
 0xf97   :  { %v1067_v48 = vadd.f32 %v1553_v44, %v1066_v47  ;;  %v1248_v47 = vld [vmem:[#allocation13 + $0xa8] sm:$0xff] }
 0xf98   :  { %1325 = vmatpush.msrb.mxu2 %v1248_v47 }
 0xf99   :  { %v1071_v51 = vsel %vm1070_vm6, %v1553_v44, %v1067_v48  ;;  %v1264_v48 = vld [vmem:[#allocation13 + $0x128] sm:$0xff] }
 0xf9a   :  { %v1076_v56 = vsel %vm1073_vm7, %v1075_v53, %v1071_v51  ;;  %1326 = vmatpush.msrb.mxu2 %v1247_v49  ;;  %v1246_v51 = vld [vmem:[#allocation13 + $0x98] sm:$0xff] }
 0xf9b   :  { %v1094_v59 = vmul.f32 %v1076_v56, %v1005_v19  ;;  %v1274_v19 = vld [vmem:[#allocation13 + $0x178] sm:$0xff] }
 0xf9c   :  { %1335 = vmatpush.msrb.mxu3 %v1274_v19  ;;  %v1262_v53 = vld [vmem:[#allocation13 + $0x118] sm:$0xff]  ;;  %1327 = vmatpush.msrb.mxu2 %v1246_v51  ;;  %v1283_v51 = vld [vmem:[#allocation13 + $0x1c0] sm:$0xff] }
 0xf9e   :  { %1336 = vmatpush.msrb.mxu3 %v1273_v21 }
 0xfa0   :  { %1337 = vmatpush.msrb.mxu3 %v1272_v23 }
 0xfa2   :  { %1338 = vmatpush.msrb.mxu3 %v1271_v25 }
 0xfa4   :  { %1339 = vmatpush.msrb.mxu3 %v1270_v28 }
 0xfa6   :  { %1340 = vmatpush.msrb.mxu3 %v1269_v30  ;;  %v1231_v30 = vld [vmem:[#allocation13 + $0x20] sm:$0xff] }
 0xfa8   :  { %1341 = vmatpush.msrb.mxu3 %v1268_v31  ;;  %v1229_v31 = vld [vmem:[#allocation13 + $0x10] sm:$0xff] }
 0xfaa   :  { %1342 = vmatpush.msrb.mxu3 %v1267_v35 }
 0xfac   :  { %1343 = vmatpush.msrb.mxu3 %v1266_v38 }
 0xfae   :  { %1344 = vmatpush.msrb.mxu3 %v1265_v40 }
 0xfb0   :  { %1345 = vmatpush.msrb.mxu3 %v1264_v48  ;;  %v1285_v48 = vld [vmem:[#allocation13 + $0x1d0] sm:$0xff] }
 0xfb2   :  { %1346 = vmatpush.msrb.mxu3 %v1263_v50 }
 0xfb4   :  { %1347 = vmatpush.msrb.mxu3 %v1262_v53 }
 0xff9   :  { %v1097_v54 = vpop.permute.xlu1 %1096 }
 0xffa   :  { %v1099_v57 = vmul.f32 %v1097_v54, %v1076_v56  ;;  %v1260_v54 = vld [vmem:[#allocation13 + $0x108] sm:$0xff]  ;;  %v1243_v56 = vld [vmem:[#allocation13 + $0x80] sm:$0xff] }
 0xffc   :  { %1101 = vrot.lane.b32.xlu2 %v1099_v57, %s1787_s27  ;;  %v1259_v57 = vld [vmem:[#allocation13 + $0x100] sm:$0xff] }
0x1056   :  { %v1102_v60 = vpop.permute.xlu2 %1101 }
0x1057   :  { %v2176_v61 = vadd.f32 %v1102_v60, %v1094_v59  ;;  %v1242_v60 = vld [vmem:[#allocation13 + $0x78] sm:$0xff] }
0x1058   :  { %1295 = vmatpush.msra.mxu1 %v1242_v60 }
0x1059   :  { %1554 = vtanh.f32 %v2176_v61 }
0x105a   :  { %1556 = vpow2.f32 %v1430_v0 }
0x105f   :  { %v1555_v63 = vpop.eup %1554 }
0x1060   :  { %1107 = vrot.lane.b32.xlu0 %v1555_v63, %s1787_s27  ;;  %v1557_v1 = vpop.eup %1556  ;;  %v1241_v63 = vld [vmem:[#allocation13 + $0x70] sm:$0xff] }
0x1061   :  { %v1062_v3 = vadd.f32 1.0, %v1557_v1  ;;  %v1240_v1 = vld [vmem:[#allocation13 + $0x68] sm:$0xff]  ;;  %1296 = vmatpush.msra.mxu1 %v1241_v63  ;;  %v1279_v63 = vld [vmem:[#allocation13 + $0x1a0] sm:$0xff] }
0x1063   :  { %1558 = vrcp.f32 %v1062_v3  ;;  %v1089_v62 = vand.u32 2147483648, %v1062_v3  ;;  %vm1083_vm10 = vweird.f32 %v1062_v3  ;;  %v1087_v10 = vand.u32 2147483647, %v1062_v3  ;;  %1297 = vmatpush.msra.mxu1 %v1240_v1  ;;  %v1277_v1 = vld [vmem:[#allocation13 + $0x190] sm:$0xff] }
0x1065   :  { %v1090_v12 = vor.u32 1.1754944e-38, %v1089_v62  ;;  %vm1088_vm12 = vcmp.eq.f32.partialorder %v1087_v10, 8.507059e+37  ;;  %v1235_v62 = vld [vmem:[#allocation13 + $0x40] sm:$0xff] }
0x1069   :  { %v1559_v4 = vpop.eup %1558 }
0x106a   :  { %v1079_v6 = vmul.f32 %v1559_v4, %v1062_v3  ;;  %vm1084_vm9 = vweird.f32 %v1559_v4  ;;  %v1239_v3 = vld [vmem:[#allocation13 + $0x60] sm:$0xff] }
0x106b   :  { %vm1085_vm11 = vmor %vm1083_vm10, %vm1084_vm9  ;;  %1298 = vmatpush.msra.mxu1 %v1239_v3  ;;  %v1276_v3 = vld [vmem:[#allocation13 + $0x188] sm:$0xff] }
0x106c   :  { %v1080_v7 = vsub.f32 1.0, %v1079_v6  ;;  %v1238_v6 = vld [vmem:[#allocation13 + $0x58] sm:$0xff] }
0x106d   :  { %1299 = vmatpush.msra.mxu1 %v1238_v6 }
0x106e   :  { %v1081_v8 = vmul.f32 %v1559_v4, %v1080_v7  ;;  %v1237_v7 = vld [vmem:[#allocation13 + $0x50] sm:$0xff] }
0x106f   :  { %1300 = vmatpush.msra.mxu1 %v1237_v7 }
0x1070   :  { %v1082_v5 = vadd.f32 %v1559_v4, %v1081_v8 }
0x1072   :  { %v1086_v11 = vsel %vm1085_vm11, %v1559_v4, %v1082_v5  ;;  %v1236_v5 = vld [vmem:[#allocation13 + $0x48] sm:$0xff] }
0x1073   :  { %v1091_v13 = vsel %vm1088_vm12, %v1090_v12, %v1086_v11  ;;  %1301 = vmatpush.msra.mxu1 %v1236_v5  ;;  %v1234_v12 = vld [vmem:[#allocation13 + $0x38] sm:$0xff] }
0x1075   :  { %1302 = vmatpush.msra.mxu1 %v1235_v62 }
0x1077   :  { %1303 = vmatpush.msra.mxu1 %v1234_v12 }
0x10d2   :  { %v1108_v15 = vpop.permute.xlu0 %1107 }
0x10d3   :  { %v2180_v17 = vmul.f32 %v1108_v15, %v1091_v13  ;;  %v1233_v15 = vld [vmem:[#allocation13 + $0x30] sm:$0xff] }
0x10d4   :  { %1304 = vmatpush.msra.mxu1 %v1233_v15 }
0x10d5   :  { %1431 = vmatmul.msk.f32.vlgmr.msra.gmra.mxu3 %vm304_vm8, %v2180_v17  ;;  %1432 = vmatmul.msk.f32.vlgmr.msra.gmra.mxu0 %vm304_vm8, %v2180_v17 }
0x10d6   :  { %1305 = vmatpush.msra.mxu1 %v1232_v20 }
0x10d8   :  { %1306 = vmatpush.msra.mxu1 %v1231_v30 }
0x10da   :  { %1307 = vmatpush.msra.mxu1 %v1230_v26 }
0x10dc   :  { %1308 = vmatpush.msra.mxu1 %v1229_v31 }
0x1152   :  { %v1151_v32 = vpop.f32.mrf.mxu0 }
0x1153   :  { %v2187_v36 = vadd.f32 %v1151_v32, %v2014_v9  ;;  %v1451_v9 = vpack.i.bf16 %v2166_v52, %v2144_v14  ;;  %v1245_v14 = vld [vmem:[#allocation13 + $0x90] sm:$0xff]  ;;  %v1228_v32 = vld [vmem:[#allocation13 + $0x8] sm:$0xff] }
0x1154   :  { %v1261_v52 = vld [vmem:[#allocation13 + $0x110] sm:$0xff]  ;;  %1328 = vmatpush.msrb.mxu2 %v1245_v14  ;;  %1309 = vmatpush.msra.mxu1 %v1228_v32  ;;  %v1282_v14 = vld [vmem:[#allocation13 + $0x1b8] sm:$0xff] }
0x1155   :  { %1560 = vtanh.f32 %v2187_v36  ;;  %1348 = vmatpush.msrb.mxu3 %v1261_v52  ;;  %v1434_v39 = vmul.f32 -1.442695, %v2187_v36  ;;  %v1284_v36 = vld [vmem:[#allocation13 + $0x1c8] sm:$0xff] }
0x1156   :  { %1310 = vmatpush.msra.mxu1 %v1227_v34 }
0x1157   :  { %1349 = vmatpush.msrb.mxu3 %v1260_v54  ;;  %v1281_v54 = vld [vmem:[#allocation13 + $0x1b0] sm:$0xff] }
0x1158   :  { %v1131_v42 = vpop.f32.mrf.mxu3 }
0x1159   :  { %v1132_v43 = vadd.f32 %v1131_v42, %v2018_v16  ;;  %v1244_v16 = vld [vmem:[#allocation13 + $0x88] sm:$0xff]  ;;  %1350 = vmatpush.msrb.mxu3 %v1259_v57 }
0x115a   :  { %1329 = vmatpush.msrb.mxu2 %v1244_v16 }
0x115b   :  { %v1561_v41 = vpop.eup %1560  ;;  %v1433_v44 = vmul.f32 -1.442695, %v1132_v43  ;;  %v1289_v43 = vld [vmem:[#allocation13 + $0x1f0] sm:$0xff] }
0x115c   :  { %1195 = vrot.lane.b32.xlu1 %v1561_v41, %s1787_s27  ;;  %1330 = vmatpush.msrb.mxu2 %v1243_v56 }
0x115d   :  { %1562 = vpow2.f32 %v1433_v44  ;;  %v1288_v44 = vld [vmem:[#allocation13 + $0x1e8] sm:$0xff] }
0x1163   :  { %v1563_v45 = vpop.eup %1562 }
0x1164   :  { %1452 = vrot.lane.b32.xlu1 %v1451_v9, %s1787_s27  ;;  %v1160_v46 = vadd.f32 1.0, %v1563_v45 }
0x1166   :  { %1564 = vrcp.f32 %v1160_v46  ;;  %v1173_v11 = vand.u32 2147483648, %v1160_v46  ;;  %vm1167_vm14 = vweird.f32 %v1160_v46  ;;  %v1171_v13 = vand.u32 2147483647, %v1160_v46 }
0x1168   :  { %v1174_v19 = vor.u32 1.1754944e-38, %v1173_v11  ;;  %vm1172_vm0 = vcmp.eq.f32.partialorder %v1171_v13, 8.507059e+37 }
0x116c   :  { %v1565_v59 = vpop.eup %1564 }
0x116d   :  { %v1163_v0 = vmul.f32 %v1565_v59, %v1160_v46  ;;  %vm1168_vm13 = vweird.f32 %v1565_v59  ;;  %v1287_v46 = vld [vmem:[#allocation13 + $0x1e0] sm:$0xff] }
0x116e   :  { %vm1169_vm15 = vmor %vm1167_vm14, %vm1168_vm13 }
0x116f   :  { %v1164_v4 = vsub.f32 1.0, %v1163_v0  ;;  %v1278_v0 = vld [vmem:[#allocation13 + $0x198] sm:$0xff] }
0x1171   :  { %v1165_v8 = vmul.f32 %v1565_v59, %v1164_v4  ;;  %v1275_v4 = vld [vmem:[#allocation13 + $0x180] sm:$0xff] }
0x1173   :  { %v1166_v10 = vadd.f32 %v1565_v59, %v1165_v8  ;;  %v1459_v8 = vld [vmem:[%s2225_s9] ss:$0 sm:$0xff] }
0x1175   :  { %v1170_v18 = vsel %vm1169_vm15, %v1565_v59, %v1166_v10  ;;  %v1280_v59 = vld [vmem:[#allocation13 + $0x1a8] sm:$0xff] }
0x1176   :  { %v1175_v22 = vsel %vm1172_vm0, %v1174_v19, %v1170_v18 }
0x11ce   :  { %v1196_v21 = vpop.permute.xlu1 %1195 }
0x11cf   :  { %v1198_v23 = vmul.f32 %v1196_v21, %v1175_v22 }
0x11d1   :  { %1200 = vrot.lane.b32.xlu2 %v1198_v23, %s1787_s27 }
0x11d6   :  { %v1453_v24 = vpop.permute.xlu1 %1452 }
0x11d7   :  { %v1455_v25 = vunpack.i.h.bf16 %v1453_v24  ;;  %v1454_v27 = vunpack.i.l.bf16 %v1453_v24 }
0x11d9   :  { %1210 = vrot.lane.b32.xlu2 %v2085_v58, %s1787_s27  ;;  %v1224_v28 = vsel %vm304_vm8, %v2116_v33, %v1454_v27  ;;  %v1225_v29 = vsel %vm304_vm8, %v2155_v55, %v1455_v25  ;;  %v1193_v58 = vmul.f32 %v1175_v22, %v2176_v61  ;;  %v1290_v61 = vld [vmem:[#allocation13 + $0x1f8] sm:$0xff] }
0x11da   :  { %1331 = vmatmul.f32.vlgmr.msrb.gmra.mxu2 %v1224_v28  ;;  %1351 = vmatmul.f32.vlgmr.msrb.gmra.mxu3 %v1225_v29 }
0x11db   :  { %1355 = vmatpush.msrb.mxu0 %v1290_v61 }
0x11dd   :  { %1356 = vmatpush.msrb.mxu0 %v1289_v43 }
0x11df   :  { %1357 = vmatpush.msrb.mxu0 %v1288_v44 }
0x11e1   :  { %1358 = vmatpush.msrb.mxu0 %v1287_v46 }
0x122b   :  { %v1201_v35 = vpop.permute.xlu2 %1200 }
0x122c   :  { %v1203_v37 = vadd.f32 %v1201_v35, %v1193_v58 }
0x122e   :  { %1566 = vtanh.f32 %v1203_v37 }
0x122f   :  { %1568 = vpow2.f32 %v1434_v39 }
0x1233   :  { %v1211_v33 = vpop.permute.xlu2 %1210 }
0x1234   :  { %v1567_v38 = vpop.eup %1566  ;;  %v1223_v55 = vsel %vm304_vm8, %v2054_v2, %v1211_v33  ;;  %v1286_v2 = vld [vmem:[#allocation13 + $0x1d8] sm:$0xff] }
0x1235   :  { %1311 = vmatmul.f32.vlgmr.msra.gmra.mxu1 %v1223_v55  ;;  %1206 = vrot.lane.b32.xlu0 %v1567_v38, %s1787_s27  ;;  %v1569_v40 = vpop.eup %1568 }
0x1236   :  { %v1161_v41 = vadd.f32 1.0, %v1569_v40  ;;  %1359 = vmatpush.msrb.mxu0 %v1286_v2 }
0x1238   :  { %1570 = vrcp.f32 %v1161_v41  ;;  %1360 = vmatpush.msrb.mxu0 %v1285_v48  ;;  %v1188_v50 = vand.u32 2147483648, %v1161_v41  ;;  %vm1182_vm2 = vweird.f32 %v1161_v41  ;;  %v1186_v53 = vand.u32 2147483647, %v1161_v41 }
0x123a   :  { %1361 = vmatpush.msrb.mxu0 %v1284_v36  ;;  %v1189_v16 = vor.u32 1.1754944e-38, %v1188_v50  ;;  %vm1187_vm4 = vcmp.eq.f32.partialorder %v1186_v53, 8.507059e+37 }
0x123c   :  { %1362 = vmatpush.msrb.mxu0 %v1283_v51 }
0x123e   :  { %v1571_v9 = vpop.eup %1570  ;;  %1363 = vmatpush.msrb.mxu0 %v1282_v14 }
0x123f   :  { %v1178_v42 = vmul.f32 %v1571_v9, %v1161_v41  ;;  %vm1183_vm1 = vweird.f32 %v1571_v9 }
0x1240   :  { %vm1184_vm3 = vmor %vm1182_vm2, %vm1183_vm1  ;;  %1364 = vmatpush.msrb.mxu0 %v1281_v54 }
0x1241   :  { %v1179_v45 = vsub.f32 1.0, %v1178_v42 }
0x1242   :  { %1365 = vmatpush.msrb.mxu0 %v1280_v59 }
0x1243   :  { %v1180_v47 = vmul.f32 %v1571_v9, %v1179_v45 }
0x1244   :  { %1366 = vmatpush.msrb.mxu0 %v1279_v63 }
0x1245   :  { %v1181_v49 = vadd.f32 %v1571_v9, %v1180_v47 }
0x1246   :  { %1367 = vmatpush.msrb.mxu0 %v1278_v0 }
0x1247   :  { %v1185_v52 = vsel %vm1184_vm3, %v1571_v9, %v1181_v49 }
0x1248   :  { %v1190_v56 = vsel %vm1187_vm4, %v1189_v16, %v1185_v52  ;;  %1368 = vmatpush.msrb.mxu0 %v1277_v1 }
0x124a   :  { %1369 = vmatpush.msrb.mxu0 %v1276_v3 }
0x124c   :  { %1370 = vmatpush.msrb.mxu0 %v1275_v4 }
0x125d   :  { %v1332_v10 = vpop.f32.mrf.mxu2  ;;  %v1352_v12 = vpop.f32.mrf.mxu3 }
0x12a7   :  { %v1207_v57 = vpop.permute.xlu0 %1206 }
0x12a8   :  { %v1209_v60 = vmul.f32 %v1207_v57, %v1190_v56 }
0x12aa   :  { %1220 = vrot.lane.b32.xlu0 %v1209_v60, %s1787_s27 }
0x12b2   :  { %v1312_v5 = vpop.f32.mrf.mxu1 }
0x12b3   :  { %v1313_v62 = vadd.f32 %v1459_v8, %v1312_v5 }
0x12b5   :  { %v1333_v11 = vadd.f32 %v1332_v10, %v1313_v62 }
0x12b7   :  { %v1353_v13 = vadd.f32 %v1352_v12, %v1333_v11 }
0x131c   :  { %v1221_v6 = vpop.permute.xlu0 %1220 }
0x131d   :  { %v1226_v7 = vsel %vm304_vm8, %v2180_v17, %v1221_v6 }
0x131e   :  { %1371 = vmatmul.f32.vlgmr.msrb.gmra.mxu0 %v1226_v7 }
0x139b   :  { %v1372_v15 = vpop.f32.mrf.mxu0 }
0x139c   :  { %v1373_v18 = vadd.f32 %v1372_v15, %v1353_v13 }
0x139e   :  { %1375 = vst [vmem:[#allocation14] sm:$0x3] %v1373_v18 }
0x139f   :  { %1386 = dma.vmem_to_hbm [thread:$0]  %s1382_s11, 32, %s1384_s14, [#allocation4]  }
0x13a0   :  { %1772 = dma.done.wait [#allocation4], 32  }
0x13a1   :  { %1773 = vsyncadd [#allocation4], 4294967264 }
0x13a2   :  { %1391 = vsyncpa [#allocation3], 1 }
0x13a3   :  { %1392 = vsyncpa [#allocation6], 1 }
0x13a4   :  { %1393 = vsyncpa [#allocation9], 1 }
0x13a5   :  { %1394 = vsyncpa [#allocation12], 1 }
0x13a6   :  { %1395 = vsyncpa [#allocation4], 1 }

</bundles_post_ra>
